<compile_context>
chip_gen: v6e
topology: v6e:2x2x1
jax: 0.10.0
libtpu: 0.0.40
codegen_flags: <defaults>
</compile_context>

<pallas_src>
import functools

import jax
import jax.numpy as jnp
from jax.experimental import pallas as pl
from jax.experimental.pallas import tpu as pltpu

# Sentinel norm for padded columns: with U_col = 0 and Y_col = 0 the padded
# column is "dissimilar" and dist = |u|^2 + sentinel >= m, so its hinge term
# (and hence its loss contribution) is exactly zero.
_PAD_COL_NORM = 1.0e6


def _device_defaults():
    """(tile_n, num_chunks) tuned per TPU generation; safe fallback (8192, 1)."""
    kind = ""
    try:
        kind = jax.devices()[0].device_kind.lower()
    except Exception:
        pass
    if "v7" in kind or "7x" in kind:
        return 16384, 2          # 3.2 TB/s HBM, 2 TensorCores per chip
    return 8192, 1               # v5e / v6e: single TensorCore


def _resolve_params(tile_n, num_chunks):
    dt, dc = _device_defaults()
    return (dt if tile_n is None else int(tile_n),
            dc if num_chunks is None else int(num_chunks))


def _grid_geometry(num_train, tile_n, num_chunks):
    num_tiles = pl.cdiv(num_train, tile_n)
    num_chunks = max(1, min(int(num_chunks), int(num_tiles)))
    tiles_per_chunk = pl.cdiv(num_tiles, num_chunks)
    n_pad = num_chunks * tiles_per_chunk * tile_n
    return int(num_chunks), int(tiles_per_chunk), int(n_pad)


def _dsh_tile_kernel(x_ref, usq_ref, xt_ref, cn_ref, out_ref, acc_ref,
                     *, m, num_train):
    i = pl.program_id(1)            # tile of the num_train axis (reduction)
    n_i = pl.num_programs(1)
    bsz = usq_ref.shape[0]

    # ---- per-chunk init ----------------------------------------------------
    @pl.when(i == 0)
    def _init():
        acc_ref[...] = jnp.zeros_like(acc_ref)

    # ---- per-tile hot path: one fused MXU pass, lane-dense intermediates ----
    prod = jnp.dot(x_ref[...], xt_ref[...],
                   preferred_element_type=jnp.float32)        # (2B, tN)
    cross = prod[:bsz, :]                                     # u @ U^T  (B, tN)
    sim = prod[bsz:, :]                                       # y @ Y^T  (B, tN)

    dist = usq_ref[...] + cn_ref[...] - 2.0 * cross           # (B,1)+(1,tN)
    # dissimilar-pair indicator; threshold (not ==0) keeps bf16 labels exact
    y_mask = (sim < 0.5).astype(jnp.float32)
    # (1-y)/2*d + y/2*relu(m-d)  ==  0.5*d + 0.5*y*(relu(m-d) - d)
    loss_mat = 0.5 * dist + 0.5 * y_mask * (
        jnp.maximum(jnp.float32(m) - dist, 0.0) - dist)

    # element-wise accumulation only (no cross-lane reduce, no SMEM RMW)
    acc_ref[...] += loss_mat

    # ---- per-chunk finalize: single full reduce + scalar write --------------
    @pl.when(i == n_i - 1)
    def _fin():
        partial = jnp.sum(acc_ref[...]) / jnp.float32(bsz * num_train)
        out_ref[...] = jnp.full(out_ref.shape, partial, jnp.float32)


def dsh_init_state(num_train, bit, n_class, *, tile_n=None, num_chunks=None,
                   dtype=jnp.bfloat16):
    """Zero-initialized fused [U^T; Y^T] buffer + per-column-norm buffer."""
    tile_n, num_chunks = _resolve_params(tile_n, num_chunks)
    _, _, n_pad = _grid_geometry(num_train, tile_n, num_chunks)
    xt = jnp.zeros((bit + n_class, n_pad), dtype=dtype)
    col = jnp.arange(n_pad)
    cn = jnp.where(col < num_train, 0.0, _PAD_COL_NORM)
    cn = cn.astype(jnp.float32).reshape(1, n_pad)
    return xt, cn


def dsh_loss_forward(u, y, ind, xt, cn, *, num_train, m, alpha,
                     tile_n=None, num_chunks=None):
    """Returns (scalar loss, updated Xt, updated col-norms). Matches DSHLoss.forward."""
    tile_n, num_chunks = _resolve_params(tile_n, num_chunks)
    num_chunks, tiles_per_chunk, n_pad = _grid_geometry(num_train, tile_n,
                                                        num_chunks)
    assert xt.shape[1] == n_pad and cn.shape[1] == n_pad, \
        "state buffers were created with a different tile_n / num_chunks"

    bsz, bit = u.shape
    n_class = y.shape[1]
    nrows = bit + n_class

    u = u.astype(jnp.float32)
    y = y.astype(jnp.float32)
    u_q = u.astype(xt.dtype)                       # bf16-rounded codes
    y_q = y.astype(xt.dtype)                       # one-hot labels exact in bf16

    # ---- state update (glue; in-place when xt/cn are donated) --------------
    new_cols = jnp.concatenate([u_q, y_q], axis=1).T          # (bit+n_class, B)
    xt_new = xt.at[:, ind].set(new_cols)
    row_norm = jnp.sum(jnp.square(u_q.astype(jnp.float32)), axis=1)   # (B,)
    cn_new = cn.at[0, ind].set(row_norm)

    # ---- block-diagonal query: one matmul per tile gives cross AND sim -----
    x = jnp.zeros((2 * bsz, nrows), xt.dtype)
    x = x.at[:bsz, :bit].set(u_q).at[bsz:, bit:].set(y_q)
    usq = row_norm[:, None]                                     # (B, 1) f32

    kernel = functools.partial(_dsh_tile_kernel, m=float(m),
                               num_train=int(num_train))

    partials = pl.pallas_call(
        kernel,
        out_shape=jax.ShapeDtypeStruct((num_chunks, 1, 1), jnp.float32),
        grid_spec=pltpu.PrefetchScalarGridSpec(
            num_scalar_prefetch=0,
            grid=(num_chunks, tiles_per_chunk),
            in_specs=[
                pl.BlockSpec((2 * bsz, nrows), lambda c, i: (0, 0)),   # X (resident)
                pl.BlockSpec((bsz, 1), lambda c, i: (0, 0)),           # |u|^2 (resident)
                pl.BlockSpec((nrows, tile_n),
                             lambda c, i: (0, c * tiles_per_chunk + i)),  # Xt tile
                pl.BlockSpec((1, tile_n),
                             lambda c, i: (0, c * tiles_per_chunk + i)),  # col norms tile
            ],
            out_specs=pl.BlockSpec((1, 1, 1), lambda c, i: (c, 0, 0)),
            scratch_shapes=[
                pltpu.VMEM((bsz, tile_n), jnp.float32),   # element-wise loss acc
            ]),
        compiler_params=pltpu.CompilerParams(
            dimension_semantics=("parallel", "arbitrary"),
            vmem_limit_bytes=48 * 1024 * 1024),
    )(x, usq, xt_new, cn_new)

    loss1 = jnp.sum(partials)
    # tiny batch-only regularizer, exact f32 (hoisted out of the kernel)
    loss2 = jnp.float32(alpha) * jnp.mean(jnp.abs(1.0 - jnp.abs(u)))
    return loss1 + loss2, xt_new, cn_new


if __name__ == "__main__":
    # Small, deterministic sizes consistent with the module:
    #   bit=32 -> m = 2*bit = 64 ; num_train=2000 ; n_class=16 ; batch B=8
    bit = 32
    n_class = 16
    num_train = 2000          # not a tile multiple -> exercises padding path
    batch = 8
    alpha = 0.1
    m = 2 * bit

    tile_n, num_chunks = _device_defaults()

    key = jax.random.PRNGKey(0)
    k_u, k_lbl, k_ind = jax.random.split(key, 3)

    u = jax.random.normal(k_u, (batch, bit), dtype=jnp.float32)
    labels = jax.random.randint(k_lbl, (batch,), 0, n_class)
    y = jax.nn.one_hot(labels, n_class, dtype=jnp.float32)
    ind = jax.random.permutation(k_ind, num_train)[:batch]

    xt, cn = dsh_init_state(num_train, bit, n_class,
                            tile_n=tile_n, num_chunks=num_chunks)

    # Donate the state buffers so the wrapper scatter is in-place (no full
    # HBM copy of Xt / col-norms per call).
    fwd = jax.jit(
        functools.partial(dsh_loss_forward, num_train=num_train, m=m,
                          alpha=alpha, tile_n=tile_n, num_chunks=num_chunks),
        donate_argnums=(3, 4))

    loss, xt, cn = fwd(u, y, ind, xt, cn)
    loss = jax.block_until_ready(loss)

    # Reference (original formula, f32, on the logical un-padded buffers).
    U_full = xt[:bit, :num_train].astype(jnp.float32).T      # (num_train, bit)
    Y_full = xt[bit:, :num_train].astype(jnp.float32).T      # (num_train, n_class)
    dist = jnp.sum((u[:, None, :] - U_full[None, :, :]) ** 2, axis=2)
    y_mask = (y @ Y_full.T == 0).astype(jnp.float32)
    loss1_ref = jnp.mean((1.0 - y_mask) * 0.5 * dist
                         + y_mask * 0.5 * jnp.maximum(m - dist, 0.0))
    loss2_ref = alpha * jnp.mean(jnp.abs(1.0 - jnp.abs(u)))
    loss_ref = float(loss1_ref + loss2_ref)

    err = abs(float(loss) - loss_ref)
    if err > 2e-2 * abs(loss_ref) + 1e-2:
        raise AssertionError(f"mismatch: kernel={float(loss)} ref={loss_ref}")

    print("KERNEL_OK")
</pallas_src>

<mosaic_0001>
module attributes {stable_mosaic.version = 11 : i64} {
  func.func @_dsh_tile_kernel(%arg0: i32, %arg1: i32, %arg2: memref<16x48xbf16, #tpu.memory_space<vmem>>, %arg3: memref<8x1xf32, #tpu.memory_space<vmem>>, %arg4: memref<48x8192xbf16, #tpu.memory_space<vmem>>, %arg5: memref<1x8192xf32, #tpu.memory_space<vmem>>, %arg6: memref<1x1x1xf32, #tpu.memory_space<vmem>>, %arg7: memref<8x8192xf32, #tpu.memory_space<vmem>>) attributes {dimension_semantics = [#tpu.dimension_semantics<parallel>, #tpu.dimension_semantics<arbitrary>], iteration_bounds = array<i64: 1, 1>, scalar_prefetch = 0 : i64, scratch_operands = 1 : i64, tpu.core_type = #tpu.core_type<tc>, window_params = [{pipeline_mode = #tpu.pipeline_mode<synchronous>, transform_indices = @transform_0, window_bounds = array<i64: 16, 48>}, {pipeline_mode = #tpu.pipeline_mode<synchronous>, transform_indices = @transform_1, window_bounds = array<i64: 8, 1>}, {transform_indices = @transform_2, window_bounds = array<i64: 48, 8192>}, {transform_indices = @transform_3, window_bounds = array<i64: 1, 8192>}, {transform_indices = @transform_4, window_bounds = array<i64: 1, 1, 1>}]} {
    %c0_i32 = arith.constant 0 : i32
    %0 = arith.cmpi eq, %arg1, %c0_i32 : i32
    %1 = arith.extui %0 : i1 to i32
    %c0_i32_0 = arith.constant 0 : i32
    %2 = arith.cmpi ne, %1, %c0_i32_0 : i32
    scf.if %2 {
      %cst_20 = arith.constant 0.000000e+00 : f32
      %37 = vector.broadcast %cst_20 : f32 to vector<8x8192xf32>
      %c0_21 = arith.constant 0 : index
      %c0_22 = arith.constant 0 : index
      %38 = vector.load %arg7[%c0_21, %c0_22] : memref<8x8192xf32, #tpu.memory_space<vmem>>, vector<8x8192xf32>
      tpu.vector_store %arg7[%c0_21, %c0_22], %37 {strides = array<i32>} : memref<8x8192xf32, #tpu.memory_space<vmem>>, vector<8x8192xf32>,
    } else {
    }
    %c0 = arith.constant 0 : index
    %c0_1 = arith.constant 0 : index
    %3 = vector.load %arg2[%c0, %c0_1] : memref<16x48xbf16, #tpu.memory_space<vmem>>, vector<16x48xbf16>
    %c0_2 = arith.constant 0 : index
    %c0_3 = arith.constant 0 : index
    %4 = vector.load %arg4[%c0_2, %c0_3] : memref<48x8192xbf16, #tpu.memory_space<vmem>>, vector<48x8192xbf16>
    %cst = arith.constant dense<0.000000e+00> : vector<16x8192xf32>
    %5 = tpu.matmul %3, %4, %cst {dimension_numbers = #tpu.dot_dimension_numbers<[1], [0], [0], [1], [0, 0, 1, 1], [], []>} : vector<16x48xbf16>, vector<48x8192xbf16>, vector<16x8192xf32> -> vector<16x8192xf32>
    %6 = vector.extract_strided_slice %5 {offsets = [0, 0], sizes = [8, 8192], strides = [1, 1]} : vector<16x8192xf32> to vector<8x8192xf32>
    %7 = vector.extract_strided_slice %5 {offsets = [8, 0], sizes = [8, 8192], strides = [1, 1]} : vector<16x8192xf32> to vector<8x8192xf32>
    %c0_4 = arith.constant 0 : index
    %c0_5 = arith.constant 0 : index
    %8 = vector.load %arg3[%c0_4, %c0_5] : memref<8x1xf32, #tpu.memory_space<vmem>>, vector<8x1xf32>
    %c0_6 = arith.constant 0 : index
    %c0_7 = arith.constant 0 : index
    %9 = vector.load %arg5[%c0_6, %c0_7] : memref<1x8192xf32, #tpu.memory_space<vmem>>, vector<1x8192xf32>
    %10 = vector.broadcast %8 : vector<8x1xf32> to vector<8x8192xf32>
    %11 = vector.broadcast %9 : vector<1x8192xf32> to vector<8x8192xf32>
    %12 = arith.addf %10, %11 : vector<8x8192xf32>
    %cst_8 = arith.constant 2.000000e+00 : f32
    %13 = vector.broadcast %cst_8 : f32 to vector<8x8192xf32>
    %14 = arith.mulf %13, %6 : vector<8x8192xf32>
    %15 = arith.subf %12, %14 : vector<8x8192xf32>
    %cst_9 = arith.constant 5.000000e-01 : f32
    %16 = vector.broadcast %cst_9 : f32 to vector<8x8192xf32>
    %17 = arith.cmpf olt, %7, %16 : vector<8x8192xf32>
    %18 = arith.extui %17 : vector<8x8192xi1> to vector<8x8192xi32>
    %19 = arith.sitofp %18 : vector<8x8192xi32> to vector<8x8192xf32>
    %cst_10 = arith.constant 5.000000e-01 : f32
    %20 = vector.broadcast %cst_10 : f32 to vector<8x8192xf32>
    %21 = arith.mulf %20, %15 : vector<8x8192xf32>
    %cst_11 = arith.constant 5.000000e-01 : f32
    %22 = vector.broadcast %cst_11 : f32 to vector<8x8192xf32>
    %23 = arith.mulf %22, %19 : vector<8x8192xf32>
    %cst_12 = arith.constant 6.400000e+01 : f32
    %24 = vector.broadcast %cst_12 : f32 to vector<8x8192xf32>
    %25 = arith.subf %24, %15 : vector<8x8192xf32>
    %cst_13 = arith.constant 0.000000e+00 : f32
    %26 = vector.broadcast %cst_13 : f32 to vector<8x8192xf32>
    %27 = arith.maximumf %25, %26 : vector<8x8192xf32>
    %28 = arith.subf %27, %15 : vector<8x8192xf32>
    %29 = arith.mulf %23, %28 : vector<8x8192xf32>
    %30 = arith.addf %21, %29 : vector<8x8192xf32>
    %c0_14 = arith.constant 0 : index
    %c0_15 = arith.constant 0 : index
    %31 = vector.load %arg7[%c0_14, %c0_15] : memref<8x8192xf32, #tpu.memory_space<vmem>>, vector<8x8192xf32>
    %32 = arith.addf %31, %30 : vector<8x8192xf32>
    %c0_16 = arith.constant 0 : index
    %c0_17 = arith.constant 0 : index
    %33 = vector.load %arg7[%c0_16, %c0_17] : memref<8x8192xf32, #tpu.memory_space<vmem>>, vector<8x8192xf32>
    tpu.vector_store %arg7[%c0_16, %c0_17], %32 {strides = array<i32>} : memref<8x8192xf32, #tpu.memory_space<vmem>>, vector<8x8192xf32>,
    %c0_i32_18 = arith.constant 0 : i32
    %34 = arith.cmpi eq, %arg1, %c0_i32_18 : i32
    %35 = arith.extui %34 : i1 to i32
    %c0_i32_19 = arith.constant 0 : i32
    %36 = arith.cmpi ne, %35, %c0_i32_19 : i32
    scf.if %36 {
      %c0_20 = arith.constant 0 : index
      %c0_21 = arith.constant 0 : index
      %37 = vector.load %arg7[%c0_20, %c0_21] : memref<8x8192xf32, #tpu.memory_space<vmem>>, vector<8x8192xf32>
      %38 = vector.shape_cast %37 : vector<8x8192xf32> to vector<1x8x8192xf32>
      %cst_22 = arith.constant dense<0.000000e+00> : vector<1xf32>
      %39 = vector.multi_reduction <add>, %38, %cst_22 [1, 2] : vector<1x8x8192xf32> to vector<1xf32>
      %40 = vector.shape_cast %39 : vector<1xf32> to vector<1x1x1xf32>
      %41 = vector.extract %40[0, 0, 0] : f32 from vector<1x1x1xf32>
      %cst_23 = arith.constant 1.600000e+04 : f32
      %42 = arith.divf %41, %cst_23 : f32
      %43 = vector.broadcast %42 : f32 to vector<1x1x1xf32>
      %c0_24 = arith.constant 0 : index
      %c0_25 = arith.constant 0 : index
      %c0_26 = arith.constant 0 : index
      %44 = vector.load %arg6[%c0_24, %c0_25, %c0_26] : memref<1x1x1xf32, #tpu.memory_space<vmem>>, vector<1x1x1xf32>
      tpu.vector_store %arg6[%c0_24, %c0_25, %c0_26], %43 {strides = array<i32>} : memref<1x1x1xf32, #tpu.memory_space<vmem>>, vector<1x1x1xf32>,
    } else {
    }
    return
  }
  func.func @transform_0(%arg0: i32, %arg1: i32) -> (i32, i32) {
    %c0_i32 = arith.constant 0 : i32
    %c0_i32_0 = arith.constant 0 : i32
    %c0_i32_1 = arith.constant 0 : i32
    return %c0_i32, %c0_i32_0 : i32, i32
  }
  func.func @transform_1(%arg0: i32, %arg1: i32) -> (i32, i32) {
    %c0_i32 = arith.constant 0 : i32
    %c0_i32_0 = arith.constant 0 : i32
    %c0_i32_1 = arith.constant 0 : i32
    return %c0_i32, %c0_i32_0 : i32, i32
  }
  func.func @transform_2(%arg0: i32, %arg1: i32) -> (i32, i32) {
    %c1_i32 = arith.constant 1 : i32
    %0 = arith.muli %arg0, %c1_i32 : i32
    %1 = arith.addi %0, %arg1 : i32
    %c0_i32 = arith.constant 0 : i32
    %c0_i32_0 = arith.constant 0 : i32
    return %c0_i32, %1 : i32, i32
  }
  func.func @transform_3(%arg0: i32, %arg1: i32) -> (i32, i32) {
    %c1_i32 = arith.constant 1 : i32
    %0 = arith.muli %arg0, %c1_i32 : i32
    %1 = arith.addi %0, %arg1 : i32
    %c0_i32 = arith.constant 0 : i32
    %c0_i32_0 = arith.constant 0 : i32
    return %c0_i32, %1 : i32, i32
  }
  func.func @transform_4(%arg0: i32, %arg1: i32) -> (i32, i32, i32) {
    %c0_i32 = arith.constant 0 : i32
    %c0_i32_0 = arith.constant 0 : i32
    %c0_i32_1 = arith.constant 0 : i32
    return %arg0, %c0_i32, %c0_i32_0 : i32, i32, i32
  }
}

</mosaic_0001>

<bundles_post_ra>
// kernel: dsh_loss_forward.1
= control target key start
LH: loop header
LB: loop body
LE: loop exit
PB: predicated region body
PF: predicated region fallthrough
CT: control target
= control target key end

     0   :  { %v4520_v8 = vmov 0   ;;  %vm1287_vm0 = vcmask 392192   ;;  %s5902_s0 = inlined_call_operand.vmem [shape: bf16[16,48], index: 0, kind: input, shape index: {}]   ;;  %s5903_s1 = inlined_call_operand.vmem [shape: f32[8,1], index: 1, kind: input, shape index: {}]   ;;  %s5904_s2 = inlined_call_operand.vmem [shape: bf16[48,8192], index: 2, kind: input, shape index: {}]   ;;  %s5905_s3 = inlined_call_operand.vmem [shape: f32[1,8192], index: 3, kind: input, shape index: {}]   ;;  %s5906_s4 = inlined_call_operand.hbm [shape: f32[1,1,1], index: 4, kind: output, shape index: {}]  }
   0x1   :  { %v258_v0 = vld [vmem:[%s5904_s2 + $0x400] sm:$0xff]  ;;  %v259_v2 = vld [vmem:[%s5904_s2 + $0x408] sm:$0xff]  ;;  %1323 = vmatprep.mubr.bf16.mxu0 %v4520_v8  ;;  %1366 = vmatprep.mubr.bf16.mxu1 %v4520_v8  ;;  %v260_v23 = vld [vmem:[%s5904_s2 + $0x410] sm:$0xff] }
   0x2   :  { %v290_v1 = vld [vmem:[%s5904_s2 + $0x500] sm:$0xff]  ;;  %v291_v4 = vld [vmem:[%s5904_s2 + $0x508] sm:$0xff]  ;;  %4495 = vset.pattern.permute.xlu0 %v4520_v8  ;;  %v292_v24 = vld [vmem:[%s5904_s2 + $0x510] sm:$0xff] }
   0x3   :  { %v4331_v3 = vcombine.high %v258_v0, %v290_v1  ;;  %v4330_v5 = vcombine.low %v258_v0, %v290_v1  ;;  %v194_v6 = vld [vmem:[%s5904_s2 + $0x200] sm:$0xff]  ;;  %v4333_v9 = vcombine.high %v259_v2, %v291_v4  ;;  %v4332_v10 = vcombine.low %v259_v2, %v291_v4  ;;  %v195_v12 = vld [vmem:[%s5904_s2 + $0x208] sm:$0xff]  ;;  %v261_v25 = vld [vmem:[%s5904_s2 + $0x418] sm:$0xff] }
   0x4   :  { %v226_v7 = vld [vmem:[%s5904_s2 + $0x300] sm:$0xff]  ;;  %v227_v13 = vld [vmem:[%s5904_s2 + $0x308] sm:$0xff]  ;;  %v293_v26 = vld [vmem:[%s5904_s2 + $0x518] sm:$0xff]  ;;  %v4335_v29 = vcombine.high %v260_v23, %v292_v24  ;;  %v4334_v36 = vcombine.low %v260_v23, %v292_v24 }
   0x5   :  { %v4267_v11 = vcombine.high %v194_v6, %v226_v7  ;;  %v130_v14 = vld [vmem:[%s5904_s2] sm:$0xff]  ;;  %1301 = vmatprep.subr.bf16.mxu0 %v4331_v3  ;;  %v4269_v15 = vcombine.high %v195_v12, %v227_v13  ;;  %v131_v17 = vld [vmem:[%s5904_s2 + $0x8] sm:$0xff]  ;;  %1344 = vmatprep.subr.bf16.mxu1 %v4333_v9  ;;  %v4266_v19 = vcombine.low %v194_v6, %v226_v7  ;;  %v196_v31 = vld [vmem:[%s5904_s2 + $0x210] sm:$0xff] }
   0x6   :  { %v162_v16 = vld [vmem:[%s5904_s2 + $0x100] sm:$0xff]  ;;  %v163_v18 = vld [vmem:[%s5904_s2 + $0x108] sm:$0xff]  ;;  %1302 = vmatpush1.bf16.msra.mxu0 %v4330_v5  ;;  %1345 = vmatpush1.bf16.msra.mxu1 %v4332_v10  ;;  %v4268_v20 = vcombine.low %v195_v12, %v227_v13  ;;  %v4337_v30 = vcombine.high %v261_v25, %v293_v26  ;;  %v228_v32 = vld [vmem:[%s5904_s2 + $0x310] sm:$0xff]  ;;  %v4336_v37 = vcombine.low %v261_v25, %v293_v26 }
   0x7   :  { %1303 = vmatprep.subr.bf16.mxu0 %v4267_v11  ;;  %v4203_v21 = vcombine.high %v130_v14, %v162_v16  ;;  %1346 = vmatprep.subr.bf16.mxu1 %v4269_v15  ;;  %v4205_v22 = vcombine.high %v131_v17, %v163_v18  ;;  %v4202_v27 = vcombine.low %v130_v14, %v162_v16  ;;  %v4608_v33 = vld [vmem:[%s5902_s0] sm:$0xff]   ;;  %v197_v34 = vld [vmem:[%s5904_s2 + $0x218] sm:$0xff]  ;;  %v132_v40 = vld [vmem:[%s5904_s2 + $0x10] sm:$0xff] }
   0x8   :  { %v4204_v28 = vcombine.low %v131_v17, %v163_v18  ;;  %v229_v35 = vld [vmem:[%s5904_s2 + $0x318] sm:$0xff]  ;;  %v4271_v38 = vcombine.high %v196_v31, %v228_v32  ;;  %v164_v41 = vld [vmem:[%s5904_s2 + $0x110] sm:$0xff]  ;;  %v4270_v44 = vcombine.low %v196_v31, %v228_v32  ;;  %v262_v48 = vld [vmem:[%s5904_s2 + $0x420] sm:$0xff] }
   0x9   :  { %v4273_v39 = vcombine.high %v197_v34, %v229_v35  ;;  %v133_v42 = vld [vmem:[%s5904_s2 + $0x18] sm:$0xff]  ;;  %v4272_v45 = vcombine.low %v197_v34, %v229_v35  ;;  %v4207_v46 = vcombine.high %v132_v40, %v164_v41  ;;  %v294_v49 = vld [vmem:[%s5904_s2 + $0x520] sm:$0xff]  ;;  %v263_v50 = vld [vmem:[%s5904_s2 + $0x428] sm:$0xff]  ;;  %v4206_v52 = vcombine.low %v132_v40, %v164_v41 }
   0xa   :  { %1304 = vmatpush1.bf16.msra.mxu0 %v4266_v19  ;;  %1347 = vmatpush1.bf16.msra.mxu1 %v4268_v20  ;;  %v165_v43 = vld [vmem:[%s5904_s2 + $0x118] sm:$0xff]  ;;  %v295_v51 = vld [vmem:[%s5904_s2 + $0x528] sm:$0xff]  ;;  %v4339_v54 = vcombine.high %v262_v48, %v294_v49  ;;  %v198_v56 = vld [vmem:[%s5904_s2 + $0x220] sm:$0xff]  ;;  %v4338_v60 = vcombine.low %v262_v48, %v294_v49 }
   0xb   :  { %1305 = vmatprep.subr.bf16.mxu0 %v4203_v21  ;;  %1348 = vmatprep.subr.bf16.mxu1 %v4205_v22  ;;  %v4209_v47 = vcombine.high %v133_v42, %v165_v43  ;;  %v4208_v53 = vcombine.low %v133_v42, %v165_v43  ;;  %v4341_v55 = vcombine.high %v263_v50, %v295_v51  ;;  %v230_v57 = vld [vmem:[%s5904_s2 + $0x320] sm:$0xff]  ;;  %v199_v58 = vld [vmem:[%s5904_s2 + $0x228] sm:$0xff]  ;;  %v264_v10 = vld [vmem:[%s5904_s2 + $0x430] sm:$0xff] }
   0xc   :  { %v231_v59 = vld [vmem:[%s5904_s2 + $0x328] sm:$0xff]  ;;  %v4340_v61 = vcombine.low %v263_v50, %v295_v51  ;;  %v4275_v62 = vcombine.high %v198_v56, %v230_v57  ;;  %v134_v0 = vld [vmem:[%s5904_s2 + $0x20] sm:$0xff]  ;;  %v4274_v4 = vcombine.low %v198_v56, %v230_v57  ;;  %v296_v11 = vld [vmem:[%s5904_s2 + $0x530] sm:$0xff] }
   0xd   :  { %v4277_v63 = vcombine.high %v199_v58, %v231_v59  ;;  %v166_v1 = vld [vmem:[%s5904_s2 + $0x120] sm:$0xff]  ;;  %v135_v2 = vld [vmem:[%s5904_s2 + $0x28] sm:$0xff]  ;;  %v4276_v5 = vcombine.low %v199_v58, %v231_v59  ;;  %v265_v12 = vld [vmem:[%s5904_s2 + $0x438] sm:$0xff]  ;;  %v4343_v16 = vcombine.high %v264_v10, %v296_v11  ;;  %v4342_v22 = vcombine.low %v264_v10, %v296_v11 }
   0xe   :  { %1306 = vmatpush1.bf16.msra.mxu0 %v4202_v27  ;;  %1349 = vmatpush1.bf16.msra.mxu1 %v4204_v28  ;;  %v167_v3 = vld [vmem:[%s5904_s2 + $0x128] sm:$0xff]  ;;  %v4211_v6 = vcombine.high %v134_v0, %v166_v1  ;;  %v2667_v7 = vld [vmem:[%s5903_s1] sm:$0xff]  ;;  %v297_v13 = vld [vmem:[%s5904_s2 + $0x538] sm:$0xff]  ;;  %v4210_v14 = vcombine.low %v134_v0, %v166_v1 }
   0xf   :  { %1387 = vmatprep.subr.bf16.mxu0 %v4335_v29  ;;  %1430 = vmatprep.subr.bf16.mxu1 %v4337_v30  ;;  %v4213_v9 = vcombine.high %v135_v2, %v167_v3  ;;  %v4212_v15 = vcombine.low %v135_v2, %v167_v3  ;;  %v4345_v17 = vcombine.high %v265_v12, %v297_v13  ;;  %v200_v18 = vld [vmem:[%s5904_s2 + $0x230] sm:$0xff]  ;;  %v201_v20 = vld [vmem:[%s5904_s2 + $0x238] sm:$0xff]  ;;  %v266_v35 = vld [vmem:[%s5904_s2 + $0x440] sm:$0xff] }
  0x10   :  { %2678 = vperm.xlu0 %4495, %v2667_v7   ;;  %v232_v19 = vld [vmem:[%s5904_s2 + $0x330] sm:$0xff]  ;;  %v233_v21 = vld [vmem:[%s5904_s2 + $0x338] sm:$0xff]  ;;  %v4344_v23 = vcombine.low %v265_v12, %v297_v13  ;;  %v202_v43 = vld [vmem:[%s5904_s2 + $0x240] sm:$0xff] }
  0x11   :  { %4394 = vmatmul.mubr.msk.bf16.vlgmr.msra.gmra.mxu0 %vm1287_vm0, %v4608_v33  ;;  %4395 = vmatmul.mubr.msk.bf16.vlgmr.msra.gmra.mxu1 %vm1287_vm0, %v4608_v33  ;;  %v4279_v24 = vcombine.high %v200_v18, %v232_v19  ;;  %v4281_v25 = vcombine.high %v201_v20, %v233_v21  ;;  %v136_v26 = vld [vmem:[%s5904_s2 + $0x30] sm:$0xff]  ;;  %v137_v28 = vld [vmem:[%s5904_s2 + $0x38] sm:$0xff]  ;;  %v4278_v30 = vcombine.low %v200_v18, %v232_v19  ;;  %v138_v51 = vld [vmem:[%s5904_s2 + $0x40] sm:$0xff] }
  0x12   :  { %1388 = vmatpush1.bf16.msra.mxu0 %v4334_v36  ;;  %1431 = vmatpush1.bf16.msra.mxu1 %v4336_v37  ;;  %v168_v27 = vld [vmem:[%s5904_s2 + $0x130] sm:$0xff]  ;;  %v169_v29 = vld [vmem:[%s5904_s2 + $0x138] sm:$0xff]  ;;  %v4280_v31 = vcombine.low %v201_v20, %v233_v21  ;;  %v298_v36 = vld [vmem:[%s5904_s2 + $0x540] sm:$0xff] }
  0x13   :  { %1389 = vmatprep.subr.bf16.mxu0 %v4271_v38  ;;  %1432 = vmatprep.subr.bf16.mxu1 %v4273_v39  ;;  %v4215_v32 = vcombine.high %v136_v26, %v168_v27  ;;  %v4217_v34 = vcombine.high %v137_v28, %v169_v29  ;;  %v267_v37 = vld [vmem:[%s5904_s2 + $0x448] sm:$0xff]  ;;  %v4214_v39 = vcombine.low %v136_v26, %v168_v27  ;;  %v268_v59 = vld [vmem:[%s5904_s2 + $0x450] sm:$0xff] }
  0x14   :  { %1409 = vmatprep.mubr.bf16.mxu0 %v4520_v8  ;;  %1452 = vmatprep.mubr.bf16.mxu1 %v4520_v8  ;;  %v299_v38 = vld [vmem:[%s5904_s2 + $0x548] sm:$0xff]  ;;  %v4216_v40 = vcombine.low %v137_v28, %v169_v29  ;;  %v4347_v41 = vcombine.high %v266_v35, %v298_v36  ;;  %v204_v3 = vld [vmem:[%s5904_s2 + $0x250] sm:$0xff] }
  0x15   :  { %v4349_v42 = vcombine.high %v267_v37, %v299_v38  ;;  %v4348_v48 = vcombine.low %v267_v37, %v299_v38  ;;  %v140_v12 = vld [vmem:[%s5904_s2 + $0x50] sm:$0xff] }
  0x16   :  { %1390 = vmatpush1.bf16.msra.mxu0 %v4270_v44  ;;  %1433 = vmatpush1.bf16.msra.mxu1 %v4272_v45  ;;  %v234_v44 = vld [vmem:[%s5904_s2 + $0x340] sm:$0xff]  ;;  %v203_v45 = vld [vmem:[%s5904_s2 + $0x248] sm:$0xff]  ;;  %v172_v13 = vld [vmem:[%s5904_s2 + $0x150] sm:$0xff] }
  0x17   :  { %1391 = vmatprep.subr.bf16.mxu0 %v4207_v46  ;;  %1434 = vmatprep.subr.bf16.mxu1 %v4209_v47  ;;  %v235_v46 = vld [vmem:[%s5904_s2 + $0x348] sm:$0xff]  ;;  %v4346_v47 = vcombine.low %v266_v35, %v298_v36  ;;  %v4283_v49 = vcombine.high %v202_v43, %v234_v44  ;;  %v4223_v18 = vcombine.high %v140_v12, %v172_v13 }
  0x18   :  { %v4285_v50 = vcombine.high %v203_v45, %v235_v46  ;;  %v4284_v56 = vcombine.low %v203_v45, %v235_v46 }
  0x1a   :  { %1392 = vmatpush1.bf16.msra.mxu0 %v4206_v52  ;;  %1435 = vmatpush1.bf16.msra.mxu1 %v4208_v53  ;;  %v170_v52 = vld [vmem:[%s5904_s2 + $0x140] sm:$0xff]  ;;  %v139_v53 = vld [vmem:[%s5904_s2 + $0x48] sm:$0xff] }
  0x1b   :  { %1473 = vmatprep.subr.bf16.mxu0 %v4339_v54  ;;  %1516 = vmatprep.subr.bf16.mxu1 %v4341_v55  ;;  %v171_v54 = vld [vmem:[%s5904_s2 + $0x148] sm:$0xff]  ;;  %v4282_v55 = vcombine.low %v202_v43, %v234_v44  ;;  %v4219_v57 = vcombine.high %v138_v51, %v170_v52 }
  0x1c   :  { %v4221_v58 = vcombine.high %v139_v53, %v171_v54  ;;  %v4220_v0 = vcombine.low %v139_v53, %v171_v54 }
  0x1d   :  { %4396 = vmatmul.mubr.msk.bf16.vlgmr.msra.gmra.mxu0 %vm1287_vm0, %v4608_v33  ;;  %4397 = vmatmul.mubr.msk.bf16.vlgmr.msra.gmra.mxu1 %vm1287_vm0, %v4608_v33 }
  0x1e   :  { %1474 = vmatpush1.bf16.msra.mxu0 %v4338_v60  ;;  %1517 = vmatpush1.bf16.msra.mxu1 %v4340_v61  ;;  %v300_v60 = vld [vmem:[%s5904_s2 + $0x550] sm:$0xff]  ;;  %v269_v61 = vld [vmem:[%s5904_s2 + $0x458] sm:$0xff] }
  0x1f   :  { %1475 = vmatprep.subr.bf16.mxu0 %v4275_v62  ;;  %1518 = vmatprep.subr.bf16.mxu1 %v4277_v63  ;;  %v301_v62 = vld [vmem:[%s5904_s2 + $0x558] sm:$0xff]  ;;  %v4218_v63 = vcombine.low %v138_v51, %v170_v52  ;;  %v4351_v1 = vcombine.high %v268_v59, %v300_v60  ;;  %v4350_v7 = vcombine.low %v268_v59, %v300_v60 }
  0x20   :  { %1495 = vmatprep.mubr.bf16.mxu0 %v4520_v8  ;;  %1538 = vmatprep.mubr.bf16.mxu1 %v4520_v8  ;;  %v4353_v2 = vcombine.high %v269_v61, %v301_v62 }
  0x22   :  { %1476 = vmatpush1.bf16.msra.mxu0 %v4274_v4  ;;  %1519 = vmatpush1.bf16.msra.mxu1 %v4276_v5  ;;  %v236_v4 = vld [vmem:[%s5904_s2 + $0x350] sm:$0xff]  ;;  %v205_v5 = vld [vmem:[%s5904_s2 + $0x258] sm:$0xff] }
  0x23   :  { %1477 = vmatprep.subr.bf16.mxu0 %v4211_v6  ;;  %1520 = vmatprep.subr.bf16.mxu1 %v4213_v9  ;;  %v237_v6 = vld [vmem:[%s5904_s2 + $0x358] sm:$0xff]  ;;  %v4352_v9 = vcombine.low %v269_v61, %v301_v62  ;;  %v4287_v10 = vcombine.high %v204_v3, %v236_v4 }
  0x24   :  { %v4289_v11 = vcombine.high %v205_v5, %v237_v6 }
  0x26   :  { %1478 = vmatpush1.bf16.msra.mxu0 %v4210_v14  ;;  %1521 = vmatpush1.bf16.msra.mxu1 %v4212_v15  ;;  %v141_v14 = vld [vmem:[%s5904_s2 + $0x58] sm:$0xff] }
  0x27   :  { %1559 = vmatprep.subr.bf16.mxu0 %v4343_v16  ;;  %1602 = vmatprep.subr.bf16.mxu1 %v4345_v17  ;;  %v173_v15 = vld [vmem:[%s5904_s2 + $0x158] sm:$0xff]  ;;  %v4286_v16 = vcombine.low %v204_v3, %v236_v4  ;;  %v4288_v17 = vcombine.low %v205_v5, %v237_v6 }
  0x29   :  { %4398 = vmatmul.mubr.msk.bf16.vlgmr.msra.gmra.mxu0 %vm1287_vm0, %v4608_v33  ;;  %4399 = vmatmul.mubr.msk.bf16.vlgmr.msra.gmra.mxu1 %vm1287_vm0, %v4608_v33 }
  0x2a   :  { %1560 = vmatpush1.bf16.msra.mxu0 %v4342_v22  ;;  %1603 = vmatpush1.bf16.msra.mxu1 %v4344_v23 }
  0x2b   :  { %1561 = vmatprep.subr.bf16.mxu0 %v4279_v24  ;;  %1604 = vmatprep.subr.bf16.mxu1 %v4281_v25 }
  0x2c   :  { %1581 = vmatprep.mubr.bf16.mxu0 %v4520_v8  ;;  %1624 = vmatprep.mubr.bf16.mxu1 %v4520_v8 }
  0x2e   :  { %1562 = vmatpush1.bf16.msra.mxu0 %v4278_v30  ;;  %1605 = vmatpush1.bf16.msra.mxu1 %v4280_v31 }
  0x2f   :  { %1563 = vmatprep.subr.bf16.mxu0 %v4215_v32  ;;  %1606 = vmatprep.subr.bf16.mxu1 %v4217_v34 }
  0x32   :  { %1564 = vmatpush1.bf16.msra.mxu0 %v4214_v39  ;;  %1607 = vmatpush1.bf16.msra.mxu1 %v4216_v40 }
  0x33   :  { %1645 = vmatprep.subr.bf16.mxu0 %v4347_v41  ;;  %1688 = vmatprep.subr.bf16.mxu1 %v4349_v42 }
  0x35   :  { %4400 = vmatmul.mubr.msk.bf16.vlgmr.msra.gmra.mxu0 %vm1287_vm0, %v4608_v33  ;;  %4401 = vmatmul.mubr.msk.bf16.vlgmr.msra.gmra.mxu1 %vm1287_vm0, %v4608_v33 }
  0x36   :  { %1646 = vmatpush1.bf16.msra.mxu0 %v4346_v47  ;;  %1689 = vmatpush1.bf16.msra.mxu1 %v4348_v48 }
  0x37   :  { %1647 = vmatprep.subr.bf16.mxu0 %v4283_v49  ;;  %1690 = vmatprep.subr.bf16.mxu1 %v4285_v50 }
  0x38   :  { %1667 = vmatprep.mubr.bf16.mxu0 %v4520_v8  ;;  %1710 = vmatprep.mubr.bf16.mxu1 %v4520_v8 }
  0x3a   :  { %1648 = vmatpush1.bf16.msra.mxu0 %v4282_v55  ;;  %1691 = vmatpush1.bf16.msra.mxu1 %v4284_v56 }
  0x3b   :  { %1649 = vmatprep.subr.bf16.mxu0 %v4219_v57  ;;  %1692 = vmatprep.subr.bf16.mxu1 %v4221_v58 }
  0x3e   :  { %1650 = vmatpush1.bf16.msra.mxu0 %v4218_v63  ;;  %1693 = vmatpush1.bf16.msra.mxu1 %v4220_v0 }
  0x3f   :  { %1731 = vmatprep.subr.bf16.mxu0 %v4351_v1  ;;  %1774 = vmatprep.subr.bf16.mxu1 %v4353_v2 }
  0x41   :  { %4402 = vmatmul.mubr.msk.bf16.vlgmr.msra.gmra.mxu0 %vm1287_vm0, %v4608_v33  ;;  %4403 = vmatmul.mubr.msk.bf16.vlgmr.msra.gmra.mxu1 %vm1287_vm0, %v4608_v33 }
  0x42   :  { %1732 = vmatpush1.bf16.msra.mxu0 %v4350_v7  ;;  %1775 = vmatpush1.bf16.msra.mxu1 %v4352_v9 }
  0x43   :  { %1733 = vmatprep.subr.bf16.mxu0 %v4287_v10 }
  0x44   :  { %9 = vsyncpa [#allocation4], 0  ;;  %1776 = vmatprep.subr.bf16.mxu1 %v4289_v11  ;;  %v4225_v19 = vcombine.high %v141_v14, %v173_v15  ;;  %1753 = vmatprep.mubr.bf16.mxu0 %v4520_v8  ;;  %v270_v20 = vld [vmem:[%s5904_s2 + $0x460] sm:$0xff]  ;;  %v271_v22 = vld [vmem:[%s5904_s2 + $0x468] sm:$0xff]  ;;  %v4222_v24 = vcombine.low %v140_v12, %v172_v13  ;;  %v4224_v25 = vcombine.low %v141_v14, %v173_v15 }
  0x45   :  { %v302_v21 = vld [vmem:[%s5904_s2 + $0x560] sm:$0xff]  ;;  %1796 = vmatprep.mubr.bf16.mxu1 %v4520_v8  ;;  %v303_v23 = vld [vmem:[%s5904_s2 + $0x568] sm:$0xff]  ;;  %v272_v45 = vld [vmem:[%s5904_s2 + $0x470] sm:$0xff] }
  0x46   :  { %1734 = vmatpush1.bf16.msra.mxu0 %v4286_v16  ;;  %1777 = vmatpush1.bf16.msra.mxu1 %v4288_v17  ;;  %v4355_v26 = vcombine.high %v270_v20, %v302_v21  ;;  %v4357_v27 = vcombine.high %v271_v22, %v303_v23  ;;  %v206_v28 = vld [vmem:[%s5904_s2 + $0x260] sm:$0xff]  ;;  %v207_v30 = vld [vmem:[%s5904_s2 + $0x268] sm:$0xff]  ;;  %v4354_v32 = vcombine.low %v270_v20, %v302_v21  ;;  %v304_v46 = vld [vmem:[%s5904_s2 + $0x570] sm:$0xff] }
  0x47   :  { %1735 = vmatprep.subr.bf16.mxu0 %v4223_v18  ;;  %1778 = vmatprep.subr.bf16.mxu1 %v4225_v19  ;;  %v238_v29 = vld [vmem:[%s5904_s2 + $0x360] sm:$0xff]  ;;  %v239_v31 = vld [vmem:[%s5904_s2 + $0x368] sm:$0xff]  ;;  %v4356_v34 = vcombine.low %v271_v22, %v303_v23  ;;  %v273_v47 = vld [vmem:[%s5904_s2 + $0x478] sm:$0xff]  ;;  %v4359_v51 = vcombine.high %v272_v45, %v304_v46  ;;  %v4358_v57 = vcombine.low %v272_v45, %v304_v46 }
  0x48   :  { %v4291_v35 = vcombine.high %v206_v28, %v238_v29  ;;  %v4293_v36 = vcombine.high %v207_v30, %v239_v31  ;;  %v142_v37 = vld [vmem:[%s5904_s2 + $0x60] sm:$0xff]  ;;  %v143_v39 = vld [vmem:[%s5904_s2 + $0x68] sm:$0xff]  ;;  %v4290_v41 = vcombine.low %v206_v28, %v238_v29  ;;  %v4292_v42 = vcombine.low %v207_v30, %v239_v31  ;;  %v305_v48 = vld [vmem:[%s5904_s2 + $0x578] sm:$0xff] }
  0x49   :  { %v174_v38 = vld [vmem:[%s5904_s2 + $0x160] sm:$0xff]  ;;  %v175_v40 = vld [vmem:[%s5904_s2 + $0x168] sm:$0xff]  ;;  %v4361_v52 = vcombine.high %v273_v47, %v305_v48  ;;  %v208_v53 = vld [vmem:[%s5904_s2 + $0x270] sm:$0xff]  ;;  %v4360_v58 = vcombine.low %v273_v47, %v305_v48 }
  0x4a   :  { %1736 = vmatpush1.bf16.msra.mxu0 %v4222_v24  ;;  %1779 = vmatpush1.bf16.msra.mxu1 %v4224_v25  ;;  %v4227_v43 = vcombine.high %v142_v37, %v174_v38  ;;  %v4229_v44 = vcombine.high %v143_v39, %v175_v40  ;;  %v4226_v49 = vcombine.low %v142_v37, %v174_v38  ;;  %v240_v54 = vld [vmem:[%s5904_s2 + $0x370] sm:$0xff]  ;;  %v209_v55 = vld [vmem:[%s5904_s2 + $0x278] sm:$0xff]  ;;  %v274_v5 = vld [vmem:[%s5904_s2 + $0x480] sm:$0xff] }
  0x4b   :  { %1817 = vmatprep.subr.bf16.mxu0 %v4355_v26  ;;  %1860 = vmatprep.subr.bf16.mxu1 %v4357_v27  ;;  %v4228_v50 = vcombine.low %v143_v39, %v175_v40  ;;  %v241_v56 = vld [vmem:[%s5904_s2 + $0x378] sm:$0xff]  ;;  %v4295_v59 = vcombine.high %v208_v53, %v240_v54  ;;  %v144_v61 = vld [vmem:[%s5904_s2 + $0x70] sm:$0xff]  ;;  %v4294_v1 = vcombine.low %v208_v53, %v240_v54  ;;  %v306_v6 = vld [vmem:[%s5904_s2 + $0x580] sm:$0xff] }
  0x4c   :  { %v4297_v60 = vcombine.high %v209_v55, %v241_v56  ;;  %v176_v62 = vld [vmem:[%s5904_s2 + $0x170] sm:$0xff]  ;;  %v145_v63 = vld [vmem:[%s5904_s2 + $0x78] sm:$0xff]  ;;  %v4296_v2 = vcombine.low %v209_v55, %v241_v56  ;;  %v275_v7 = vld [vmem:[%s5904_s2 + $0x488] sm:$0xff]  ;;  %v4363_v12 = vcombine.high %v274_v5, %v306_v6  ;;  %v4362_v18 = vcombine.low %v274_v5, %v306_v6 }
  0x4d   :  { %4404 = vmatmul.mubr.msk.bf16.vlgmr.msra.gmra.mxu0 %vm1287_vm0, %v4608_v33  ;;  %4405 = vmatmul.mubr.msk.bf16.vlgmr.msra.gmra.mxu1 %vm1287_vm0, %v4608_v33  ;;  %v177_v0 = vld [vmem:[%s5904_s2 + $0x178] sm:$0xff]  ;;  %v4231_v3 = vcombine.high %v144_v61, %v176_v62  ;;  %v307_v9 = vld [vmem:[%s5904_s2 + $0x588] sm:$0xff]  ;;  %v4230_v10 = vcombine.low %v144_v61, %v176_v62  ;;  %v210_v14 = vld [vmem:[%s5904_s2 + $0x280] sm:$0xff] }
  0x4e   :  { %1818 = vmatpush1.bf16.msra.mxu0 %v4354_v32  ;;  %1861 = vmatpush1.bf16.msra.mxu1 %v4356_v34  ;;  %v4233_v4 = vcombine.high %v145_v63, %v177_v0  ;;  %v4232_v11 = vcombine.low %v145_v63, %v177_v0  ;;  %v4365_v13 = vcombine.high %v275_v7, %v307_v9  ;;  %v242_v15 = vld [vmem:[%s5904_s2 + $0x380] sm:$0xff]  ;;  %v211_v16 = vld [vmem:[%s5904_s2 + $0x288] sm:$0xff]  ;;  %v276_v30 = vld [vmem:[%s5904_s2 + $0x490] sm:$0xff] }
  0x4f   :  { %1819 = vmatprep.subr.bf16.mxu0 %v4291_v35  ;;  %1862 = vmatprep.subr.bf16.mxu1 %v4293_v36  ;;  %v243_v17 = vld [vmem:[%s5904_s2 + $0x388] sm:$0xff]  ;;  %v4364_v19 = vcombine.low %v275_v7, %v307_v9  ;;  %v4299_v20 = vcombine.high %v210_v14, %v242_v15  ;;  %v146_v22 = vld [vmem:[%s5904_s2 + $0x80] sm:$0xff]  ;;  %v4298_v26 = vcombine.low %v210_v14, %v242_v15  ;;  %v308_v31 = vld [vmem:[%s5904_s2 + $0x590] sm:$0xff] }
  0x50   :  { %1839 = vmatprep.mubr.bf16.mxu0 %v4520_v8  ;;  %1882 = vmatprep.mubr.bf16.mxu1 %v4520_v8  ;;  %v4301_v21 = vcombine.high %v211_v16, %v243_v17  ;;  %v178_v23 = vld [vmem:[%s5904_s2 + $0x180] sm:$0xff]  ;;  %v147_v24 = vld [vmem:[%s5904_s2 + $0x88] sm:$0xff]  ;;  %v4300_v27 = vcombine.low %v211_v16, %v243_v17  ;;  %v277_v32 = vld [vmem:[%s5904_s2 + $0x498] sm:$0xff]  ;;  %v4367_v37 = vcombine.high %v276_v30, %v308_v31 }
  0x51   :  { %v179_v25 = vld [vmem:[%s5904_s2 + $0x188] sm:$0xff]  ;;  %v4235_v28 = vcombine.high %v146_v22, %v178_v23  ;;  %v309_v34 = vld [vmem:[%s5904_s2 + $0x598] sm:$0xff]  ;;  %v4234_v35 = vcombine.low %v146_v22, %v178_v23  ;;  %v212_v39 = vld [vmem:[%s5904_s2 + $0x290] sm:$0xff] }
  0x52   :  { %1820 = vmatpush1.bf16.msra.mxu0 %v4290_v41  ;;  %1863 = vmatpush1.bf16.msra.mxu1 %v4292_v42  ;;  %v4237_v29 = vcombine.high %v147_v24, %v179_v25  ;;  %v4236_v36 = vcombine.low %v147_v24, %v179_v25  ;;  %v4369_v38 = vcombine.high %v277_v32, %v309_v34  ;;  %v244_v40 = vld [vmem:[%s5904_s2 + $0x390] sm:$0xff]  ;;  %v213_v41 = vld [vmem:[%s5904_s2 + $0x298] sm:$0xff]  ;;  %v278_v55 = vld [vmem:[%s5904_s2 + $0x4a0] sm:$0xff] }
  0x53   :  { %1821 = vmatprep.subr.bf16.mxu0 %v4227_v43  ;;  %1864 = vmatprep.subr.bf16.mxu1 %v4229_v44  ;;  %v245_v42 = vld [vmem:[%s5904_s2 + $0x398] sm:$0xff]  ;;  %v4366_v43 = vcombine.low %v276_v30, %v308_v31  ;;  %v4368_v44 = vcombine.low %v277_v32, %v309_v34  ;;  %v4303_v45 = vcombine.high %v212_v39, %v244_v40  ;;  %v148_v47 = vld [vmem:[%s5904_s2 + $0x90] sm:$0xff]  ;;  %v310_v56 = vld [vmem:[%s5904_s2 + $0x5a0] sm:$0xff] }
  0x54   :  { %v4305_v46 = vcombine.high %v213_v41, %v245_v42  ;;  %v180_v48 = vld [vmem:[%s5904_s2 + $0x190] sm:$0xff]  ;;  %v4371_v61 = vcombine.high %v278_v55, %v310_v56  ;;  %v214_v63 = vld [vmem:[%s5904_s2 + $0x2a0] sm:$0xff] }
  0x55   :  { %v4239_v53 = vcombine.high %v148_v47, %v180_v48  ;;  %v246_v0 = vld [vmem:[%s5904_s2 + $0x3a0] sm:$0xff]  ;;  %v280_v16 = vld [vmem:[%s5904_s2 + $0x4b0] sm:$0xff] }
  0x56   :  { %1822 = vmatpush1.bf16.msra.mxu0 %v4226_v49  ;;  %1865 = vmatpush1.bf16.msra.mxu1 %v4228_v50  ;;  %v149_v49 = vld [vmem:[%s5904_s2 + $0x98] sm:$0xff]  ;;  %v4307_v5 = vcombine.high %v214_v63, %v246_v0  ;;  %v150_v7 = vld [vmem:[%s5904_s2 + $0xa0] sm:$0xff]  ;;  %v312_v17 = vld [vmem:[%s5904_s2 + $0x5b0] sm:$0xff] }
  0x57   :  { %1903 = vmatprep.subr.bf16.mxu0 %v4359_v51  ;;  %1946 = vmatprep.subr.bf16.mxu1 %v4361_v52  ;;  %v181_v50 = vld [vmem:[%s5904_s2 + $0x198] sm:$0xff]  ;;  %v4302_v51 = vcombine.low %v212_v39, %v244_v40  ;;  %v4304_v52 = vcombine.low %v213_v41, %v245_v42  ;;  %v182_v9 = vld [vmem:[%s5904_s2 + $0x1a0] sm:$0xff]  ;;  %v4375_v22 = vcombine.high %v280_v16, %v312_v17  ;;  %v216_v24 = vld [vmem:[%s5904_s2 + $0x2b0] sm:$0xff] }
  0x58   :  { %v4241_v54 = vcombine.high %v149_v49, %v181_v50  ;;  %v4243_v14 = vcombine.high %v150_v7, %v182_v9  ;;  %v248_v25 = vld [vmem:[%s5904_s2 + $0x3b0] sm:$0xff]  ;;  %v282_v41 = vld [vmem:[%s5904_s2 + $0x4c0] sm:$0xff] }
  0x59   :  { %4406 = vmatmul.mubr.msk.bf16.vlgmr.msra.gmra.mxu0 %vm1287_vm0, %v4608_v33  ;;  %4407 = vmatmul.mubr.msk.bf16.vlgmr.msra.gmra.mxu1 %vm1287_vm0, %v4608_v33  ;;  %v4311_v30 = vcombine.high %v216_v24, %v248_v25  ;;  %v152_v32 = vld [vmem:[%s5904_s2 + $0xb0] sm:$0xff]  ;;  %v314_v42 = vld [vmem:[%s5904_s2 + $0x5c0] sm:$0xff] }
  0x5a   :  { %1904 = vmatpush1.bf16.msra.mxu0 %v4358_v57  ;;  %1947 = vmatpush1.bf16.msra.mxu1 %v4360_v58  ;;  %v279_v57 = vld [vmem:[%s5904_s2 + $0x4a8] sm:$0xff]  ;;  %v184_v34 = vld [vmem:[%s5904_s2 + $0x1b0] sm:$0xff] }
  0x5b   :  { %1905 = vmatprep.subr.bf16.mxu0 %v4295_v59  ;;  %1948 = vmatprep.subr.bf16.mxu1 %v4297_v60  ;;  %v311_v58 = vld [vmem:[%s5904_s2 + $0x5a8] sm:$0xff]  ;;  %v4238_v59 = vcombine.low %v148_v47, %v180_v48  ;;  %v4240_v60 = vcombine.low %v149_v49, %v181_v50  ;;  %v4247_v39 = vcombine.high %v152_v32, %v184_v34  ;;  %v218_v49 = vld [vmem:[%s5904_s2 + $0x2c0] sm:$0xff] }
  0x5c   :  { %1925 = vmatprep.mubr.bf16.mxu0 %v4520_v8  ;;  %1968 = vmatprep.mubr.bf16.mxu1 %v4520_v8  ;;  %v4373_v62 = vcombine.high %v279_v57, %v311_v58  ;;  %v4379_v47 = vcombine.high %v282_v41, %v314_v42  ;;  %v250_v50 = vld [vmem:[%s5904_s2 + $0x3c0] sm:$0xff] }
  0x5e   :  { %1906 = vmatpush1.bf16.msra.mxu0 %v4294_v1  ;;  %1949 = vmatpush1.bf16.msra.mxu1 %v4296_v2  ;;  %v215_v1 = vld [vmem:[%s5904_s2 + $0x2a8] sm:$0xff] }
  0x5f   :  { %1907 = vmatprep.subr.bf16.mxu0 %v4231_v3  ;;  %1950 = vmatprep.subr.bf16.mxu1 %v4233_v4  ;;  %v247_v2 = vld [vmem:[%s5904_s2 + $0x3a8] sm:$0xff]  ;;  %v4370_v3 = vcombine.low %v278_v55, %v310_v56  ;;  %v4372_v4 = vcombine.low %v279_v57, %v311_v58  ;;  %v4315_v55 = vcombine.high %v218_v49, %v250_v50  ;;  %v154_v57 = vld [vmem:[%s5904_s2 + $0xc0] sm:$0xff] }
  0x60   :  { %v4309_v6 = vcombine.high %v215_v1, %v247_v2  ;;  %v186_v58 = vld [vmem:[%s5904_s2 + $0x1c0] sm:$0xff] }
  0x62   :  { %1908 = vmatpush1.bf16.msra.mxu0 %v4230_v10  ;;  %1951 = vmatpush1.bf16.msra.mxu1 %v4232_v11  ;;  %v151_v10 = vld [vmem:[%s5904_s2 + $0xa8] sm:$0xff] }
  0x63   :  { %1989 = vmatprep.subr.bf16.mxu0 %v4363_v12  ;;  %2032 = vmatprep.subr.bf16.mxu1 %v4365_v13  ;;  %v183_v11 = vld [vmem:[%s5904_s2 + $0x1a8] sm:$0xff]  ;;  %v4306_v12 = vcombine.low %v214_v63, %v246_v0  ;;  %v4308_v13 = vcombine.low %v215_v1, %v247_v2  ;;  %v4251_v63 = vcombine.high %v154_v57, %v186_v58  ;;  %v284_v1 = vld [vmem:[%s5904_s2 + $0x4d0] sm:$0xff] }
  0x64   :  { %v4245_v15 = vcombine.high %v151_v10, %v183_v11  ;;  %v316_v2 = vld [vmem:[%s5904_s2 + $0x5d0] sm:$0xff] }
  0x65   :  { %4408 = vmatmul.mubr.msk.bf16.vlgmr.msra.gmra.mxu0 %vm1287_vm0, %v4608_v33  ;;  %4409 = vmatmul.mubr.msk.bf16.vlgmr.msra.gmra.mxu1 %vm1287_vm0, %v4608_v33 }
  0x66   :  { %1990 = vmatpush1.bf16.msra.mxu0 %v4362_v18  ;;  %2033 = vmatpush1.bf16.msra.mxu1 %v4364_v19  ;;  %v281_v18 = vld [vmem:[%s5904_s2 + $0x4b8] sm:$0xff] }
  0x67   :  { %1991 = vmatprep.subr.bf16.mxu0 %v4299_v20  ;;  %2034 = vmatprep.subr.bf16.mxu1 %v4301_v21  ;;  %v313_v19 = vld [vmem:[%s5904_s2 + $0x5b8] sm:$0xff]  ;;  %v4242_v20 = vcombine.low %v150_v7, %v182_v9  ;;  %v4244_v21 = vcombine.low %v151_v10, %v183_v11  ;;  %v4383_v7 = vcombine.high %v284_v1, %v316_v2  ;;  %v220_v10 = vld [vmem:[%s5904_s2 + $0x2d0] sm:$0xff] }
  0x68   :  { %2011 = vmatprep.mubr.bf16.mxu0 %v4520_v8  ;;  %2054 = vmatprep.mubr.bf16.mxu1 %v4520_v8  ;;  %v4377_v23 = vcombine.high %v281_v18, %v313_v19  ;;  %v252_v11 = vld [vmem:[%s5904_s2 + $0x3d0] sm:$0xff] }
  0x6a   :  { %1992 = vmatpush1.bf16.msra.mxu0 %v4298_v26  ;;  %2035 = vmatpush1.bf16.msra.mxu1 %v4300_v27  ;;  %v217_v26 = vld [vmem:[%s5904_s2 + $0x2b8] sm:$0xff] }
  0x6b   :  { %1993 = vmatprep.subr.bf16.mxu0 %v4235_v28  ;;  %2036 = vmatprep.subr.bf16.mxu1 %v4237_v29  ;;  %v249_v27 = vld [vmem:[%s5904_s2 + $0x3b8] sm:$0xff]  ;;  %v4374_v28 = vcombine.low %v280_v16, %v312_v17  ;;  %v4376_v29 = vcombine.low %v281_v18, %v313_v19  ;;  %v4319_v16 = vcombine.high %v220_v10, %v252_v11  ;;  %v156_v18 = vld [vmem:[%s5904_s2 + $0xd0] sm:$0xff] }
  0x6c   :  { %v4313_v31 = vcombine.high %v217_v26, %v249_v27  ;;  %v188_v19 = vld [vmem:[%s5904_s2 + $0x1d0] sm:$0xff] }
  0x6e   :  { %1994 = vmatpush1.bf16.msra.mxu0 %v4234_v35  ;;  %2037 = vmatpush1.bf16.msra.mxu1 %v4236_v36  ;;  %v153_v35 = vld [vmem:[%s5904_s2 + $0xb8] sm:$0xff] }
  0x6f   :  { %2075 = vmatprep.subr.bf16.mxu0 %v4367_v37  ;;  %2118 = vmatprep.subr.bf16.mxu1 %v4369_v38  ;;  %v185_v36 = vld [vmem:[%s5904_s2 + $0x1b8] sm:$0xff]  ;;  %v4310_v37 = vcombine.low %v216_v24, %v248_v25  ;;  %v4312_v38 = vcombine.low %v217_v26, %v249_v27  ;;  %v4255_v24 = vcombine.high %v156_v18, %v188_v19  ;;  %v286_v26 = vld [vmem:[%s5904_s2 + $0x4e0] sm:$0xff] }
  0x70   :  { %v4249_v40 = vcombine.high %v153_v35, %v185_v36  ;;  %v318_v27 = vld [vmem:[%s5904_s2 + $0x5e0] sm:$0xff] }
  0x71   :  { %4410 = vmatmul.mubr.msk.bf16.vlgmr.msra.gmra.mxu0 %vm1287_vm0, %v4608_v33  ;;  %4411 = vmatmul.mubr.msk.bf16.vlgmr.msra.gmra.mxu1 %vm1287_vm0, %v4608_v33 }
  0x72   :  { %2076 = vmatpush1.bf16.msra.mxu0 %v4366_v43  ;;  %2119 = vmatpush1.bf16.msra.mxu1 %v4368_v44  ;;  %v283_v43 = vld [vmem:[%s5904_s2 + $0x4c8] sm:$0xff] }
  0x73   :  { %2077 = vmatprep.subr.bf16.mxu0 %v4303_v45  ;;  %2120 = vmatprep.subr.bf16.mxu1 %v4305_v46  ;;  %v315_v44 = vld [vmem:[%s5904_s2 + $0x5c8] sm:$0xff]  ;;  %v4246_v45 = vcombine.low %v152_v32, %v184_v34  ;;  %v4248_v46 = vcombine.low %v153_v35, %v185_v36  ;;  %v222_v34 = vld [vmem:[%s5904_s2 + $0x2e0] sm:$0xff] }
  0x74   :  { %2097 = vmatprep.mubr.bf16.mxu0 %v4520_v8  ;;  %2140 = vmatprep.mubr.bf16.mxu1 %v4520_v8  ;;  %v4381_v48 = vcombine.high %v283_v43, %v315_v44  ;;  %v254_v35 = vld [vmem:[%s5904_s2 + $0x3e0] sm:$0xff]  ;;  %v223_v36 = vld [vmem:[%s5904_s2 + $0x2e8] sm:$0xff] }
  0x76   :  { %2078 = vmatpush1.bf16.msra.mxu0 %v4302_v51  ;;  %2121 = vmatpush1.bf16.msra.mxu1 %v4304_v52  ;;  %v219_v51 = vld [vmem:[%s5904_s2 + $0x2c8] sm:$0xff] }
  0x77   :  { %2079 = vmatprep.subr.bf16.mxu0 %v4239_v53  ;;  %2122 = vmatprep.subr.bf16.mxu1 %v4241_v54  ;;  %v251_v52 = vld [vmem:[%s5904_s2 + $0x3c8] sm:$0xff]  ;;  %v4378_v53 = vcombine.low %v282_v41, %v314_v42  ;;  %v4380_v54 = vcombine.low %v283_v43, %v315_v44  ;;  %v4323_v41 = vcombine.high %v222_v34, %v254_v35  ;;  %v158_v43 = vld [vmem:[%s5904_s2 + $0xe0] sm:$0xff] }
  0x78   :  { %v4317_v56 = vcombine.high %v219_v51, %v251_v52  ;;  %v190_v44 = vld [vmem:[%s5904_s2 + $0x1e0] sm:$0xff] }
  0x7a   :  { %2080 = vmatpush1.bf16.msra.mxu0 %v4238_v59  ;;  %2123 = vmatpush1.bf16.msra.mxu1 %v4240_v60  ;;  %v155_v59 = vld [vmem:[%s5904_s2 + $0xc8] sm:$0xff] }
  0x7b   :  { %2161 = vmatprep.subr.bf16.mxu0 %v4371_v61  ;;  %2204 = vmatprep.subr.bf16.mxu1 %v4373_v62  ;;  %v187_v60 = vld [vmem:[%s5904_s2 + $0x1c8] sm:$0xff]  ;;  %v4314_v61 = vcombine.low %v218_v49, %v250_v50  ;;  %v4316_v62 = vcombine.low %v219_v51, %v251_v52  ;;  %v5192_v49 = vld [vmem:[%s5904_s2 + $0x5f0] sm:$0xff]  ;;  %v4322_v51 = vcombine.low %v222_v34, %v254_v35  ;;  %v5199_v52 = vld [vmem:[%s5904_s2 + $0x4f8] sm:$0xff] }
  0x7c   :  { %v4253_v0 = vcombine.high %v155_v59, %v187_v60  ;;  %v5317_v34 = vld [vmem:[%s5905_s3 + $0x10] sm:$0xff] }
  0x7d   :  { %4412 = vmatmul.mubr.msk.bf16.vlgmr.msra.gmra.mxu0 %vm1287_vm0, %v4608_v33  ;;  %4413 = vmatmul.mubr.msk.bf16.vlgmr.msra.gmra.mxu1 %vm1287_vm0, %v4608_v33 }
  0x7e   :  { %2162 = vmatpush1.bf16.msra.mxu0 %v4370_v3  ;;  %2205 = vmatpush1.bf16.msra.mxu1 %v4372_v4  ;;  %v285_v3 = vld [vmem:[%s5904_s2 + $0x4d8] sm:$0xff] }
  0x7f   :  { %2163 = vmatprep.subr.bf16.mxu0 %v4307_v5  ;;  %2206 = vmatprep.subr.bf16.mxu1 %v4309_v6  ;;  %v317_v4 = vld [vmem:[%s5904_s2 + $0x5d8] sm:$0xff]  ;;  %v4250_v5 = vcombine.low %v154_v57, %v186_v58  ;;  %v4252_v6 = vcombine.low %v155_v59, %v187_v60  ;;  %v5209_v57 = vld [vmem:[%s5904_s2 + $0x2f0] sm:$0xff] }
  0x80   :  { %2183 = vmatprep.mubr.bf16.mxu0 %v4520_v8  ;;  %2226 = vmatprep.mubr.bf16.mxu1 %v4520_v8  ;;  %v4385_v9 = vcombine.high %v285_v3, %v317_v4 }
  0x82   :  { %2164 = vmatpush1.bf16.msra.mxu0 %v4306_v12  ;;  %2207 = vmatpush1.bf16.msra.mxu1 %v4308_v13  ;;  %v221_v12 = vld [vmem:[%s5904_s2 + $0x2d8] sm:$0xff] }
  0x83   :  { %2165 = vmatprep.subr.bf16.mxu0 %v4243_v14  ;;  %2208 = vmatprep.subr.bf16.mxu1 %v4245_v15  ;;  %v253_v13 = vld [vmem:[%s5904_s2 + $0x3d8] sm:$0xff]  ;;  %v4382_v14 = vcombine.low %v284_v1, %v316_v2  ;;  %v4384_v15 = vcombine.low %v285_v3, %v317_v4  ;;  %v5239_v3 = vld [vmem:[%s5904_s2 + $0xf0] sm:$0xff] }
  0x84   :  { %v4321_v17 = vcombine.high %v221_v12, %v253_v13  ;;  %v5244_v4 = vld [vmem:[%s5904_s2 + $0x1f0] sm:$0xff] }
  0x86   :  { %2166 = vmatpush1.bf16.msra.mxu0 %v4242_v20  ;;  %2209 = vmatpush1.bf16.msra.mxu1 %v4244_v21  ;;  %v157_v20 = vld [vmem:[%s5904_s2 + $0xd8] sm:$0xff] }
  0x87   :  { %2247 = vmatprep.subr.bf16.mxu0 %v4375_v22  ;;  %2290 = vmatprep.subr.bf16.mxu1 %v4377_v23  ;;  %v189_v21 = vld [vmem:[%s5904_s2 + $0x1d8] sm:$0xff]  ;;  %v4318_v22 = vcombine.low %v220_v10, %v252_v11  ;;  %v4320_v23 = vcombine.low %v221_v12, %v253_v13 }
  0x88   :  { %v4257_v25 = vcombine.high %v157_v20, %v189_v21 }
  0x89   :  { %4414 = vmatmul.mubr.msk.bf16.vlgmr.msra.gmra.mxu0 %vm1287_vm0, %v4608_v33  ;;  %4415 = vmatmul.mubr.msk.bf16.vlgmr.msra.gmra.mxu1 %vm1287_vm0, %v4608_v33 }
  0x8a   :  { %2248 = vmatpush1.bf16.msra.mxu0 %v4374_v28  ;;  %2291 = vmatpush1.bf16.msra.mxu1 %v4376_v29  ;;  %v319_v28 = vld [vmem:[%s5904_s2 + $0x5e8] sm:$0xff]  ;;  %v4254_v29 = vcombine.low %v156_v18, %v188_v19 }
  0x8b   :  { %2249 = vmatprep.subr.bf16.mxu0 %v4311_v30  ;;  %2292 = vmatprep.subr.bf16.mxu1 %v4313_v31  ;;  %v4256_v30 = vcombine.low %v157_v20, %v189_v21  ;;  %v4387_v31 = vcombine.high %v286_v26, %v318_v27  ;;  %v4262_v21 = vcombine.low %v5239_v3, %v5244_v4 }
  0x8c   :  { %2269 = vmatprep.mubr.bf16.mxu0 %v4520_v8  ;;  %2312 = vmatprep.mubr.bf16.mxu1 %v4520_v8 }
  0x8e   :  { %2250 = vmatpush1.bf16.msra.mxu0 %v4310_v37  ;;  %2293 = vmatpush1.bf16.msra.mxu1 %v4312_v38  ;;  %v255_v37 = vld [vmem:[%s5904_s2 + $0x3e8] sm:$0xff]  ;;  %v2689_v38 = vlaneseq }
  0x8f   :  { %2251 = vmatprep.subr.bf16.mxu0 %v4247_v39  ;;  %2294 = vmatprep.subr.bf16.mxu1 %v4249_v40  ;;  %v4386_v39 = vcombine.low %v286_v26, %v318_v27  ;;  %v4325_v42 = vcombine.high %v223_v36, %v255_v37  ;;  %v5298_v26 = vld [vmem:[%s5905_s3 + $0x8] sm:$0xff] }
  0x90   :  { %v2690_v50 = vshrl.u32 %v2689_v38, 7 }
  0x92   :  { %2252 = vmatpush1.bf16.msra.mxu0 %v4246_v45  ;;  %2295 = vmatpush1.bf16.msra.mxu1 %v4248_v46  ;;  %v159_v45 = vld [vmem:[%s5904_s2 + $0xe8] sm:$0xff]  ;;  %v5177_v46 = vld [vmem:[%s5902_s0] sm:$0xff]   ;;  %v5263_v10 = vsub.s32 2, %v2690_v50  ;;  %v5265_v11 = vsub.s32 1, %v2690_v50  ;;  %v5267_v12 = vsub.s32 3, %v2690_v50  ;;  %v5269_v13 = vsub.s32 4, %v2690_v50 }
  0x93   :  { %2333 = vmatprep.subr.bf16.mxu0 %v4379_v47  ;;  %2376 = vmatprep.subr.bf16.mxu1 %v4381_v48  ;;  %v191_v47 = vld [vmem:[%s5904_s2 + $0x1e8] sm:$0xff]  ;;  %v5187_v48 = vld [vmem:[%s5904_s2 + $0x4f0] sm:$0xff] }
  0x94   :  { %v4260_v58 = vcombine.low %v159_v45, %v191_v47  ;;  %v4261_v59 = vcombine.high %v159_v45, %v191_v47  ;;  %v4390_v60 = vcombine.low %v5187_v48, %v5192_v49  ;;  %v2736_v38 = vrot.slane %v5298_v26, %v5267_v12 }
  0x95   :  { %4416 = vmatmul.mubr.msk.bf16.vlgmr.msra.gmra.mxu0 %vm1287_vm0, %v4608_v33  ;;  %4417 = vmatmul.mubr.msk.bf16.vlgmr.msra.gmra.mxu1 %vm1287_vm0, %v4608_v33  ;;  %v2764_v45 = vrot.slane %v5317_v34, %v5263_v10  ;;  %v2760_v47 = vrot.slane %v5317_v34, %v5265_v11 }
  0x96   :  { %2334 = vmatpush1.bf16.msra.mxu0 %v4378_v53  ;;  %2377 = vmatpush1.bf16.msra.mxu1 %v4380_v54  ;;  %v5204_v53 = vld [vmem:[%s5904_s2 + $0x5f8] sm:$0xff]  ;;  %v4324_v54 = vcombine.low %v223_v36, %v255_v37  ;;  %v2732_v36 = vrot.slane %v5298_v26, %v5263_v10  ;;  %v2728_v37 = vrot.slane %v5298_v26, %v5265_v11 }
  0x97   :  { %2335 = vmatprep.subr.bf16.mxu0 %v4315_v55  ;;  %2378 = vmatprep.subr.bf16.mxu1 %v4317_v56  ;;  %v4258_v55 = vcombine.low %v158_v43, %v190_v44  ;;  %v4259_v56 = vcombine.high %v158_v43, %v190_v44  ;;  %v4392_v1 = vcombine.low %v5199_v52, %v5204_v53  ;;  %v5340_v43 = vld [vmem:[%s5905_s3 + $0x18] sm:$0xff] }
  0x98   :  { %2355 = vmatprep.mubr.bf16.mxu0 %v4520_v8  ;;  %2398 = vmatprep.mubr.bf16.mxu1 %v4520_v8  ;;  %v4393_v2 = vcombine.high %v5199_v52, %v5204_v53 }
  0x9a   :  { %2336 = vmatpush1.bf16.msra.mxu0 %v4314_v61  ;;  %2379 = vmatpush1.bf16.msra.mxu1 %v4316_v62  ;;  %v5217_v61 = vld [vmem:[%s5904_s2 + $0x3f0] sm:$0xff]  ;;  %v5222_v62 = vld [vmem:[%s5904_s2 + $0x2f8] sm:$0xff] }
  0x9b   :  { %2337 = vmatprep.subr.bf16.mxu0 %v4251_v63  ;;  %2380 = vmatprep.subr.bf16.mxu1 %v4253_v0  ;;  %v5227_v63 = vld [vmem:[%s5904_s2 + $0x3f8] sm:$0xff]  ;;  %v4391_v0 = vcombine.high %v5187_v48, %v5192_v49  ;;  %v4327_v18 = vcombine.high %v5209_v57, %v5217_v61  ;;  %v2768_v48 = vrot.slane %v5317_v34, %v5267_v12 }
  0x9c   :  { %v4328_v19 = vcombine.low %v5222_v62, %v5227_v63  ;;  %v4329_v20 = vcombine.high %v5222_v62, %v5227_v63  ;;  %v2772_v49 = vrot.slane %v5317_v34, %v5269_v13  ;;  %v5388_v62 = vld [vmem:[%s5905_s3 + $0x28] sm:$0xff] }
  0x9e   :  { %2338 = vmatpush1.bf16.msra.mxu0 %v4250_v5  ;;  %2381 = vmatpush1.bf16.msra.mxu1 %v4252_v6  ;;  %v5249_v5 = vld [vmem:[%s5904_s2 + $0xf8] sm:$0xff]  ;;  %v5251_v6 = vsub.s32 0, %v2690_v50 }
  0x9f   :  { %2419 = vmatprep.subr.bf16.mxu0 %v4383_v7  ;;  %2462 = vmatprep.subr.bf16.mxu1 %v4385_v9  ;;  %v5256_v7 = vld [vmem:[%s5904_s2 + $0x1f8] sm:$0xff]  ;;  %v5261_v9 = vld [vmem:[%s5905_s3] sm:$0xff] }
  0xa0   :  { %v2700_v27 = vrot.slane %v5261_v9, %v5263_v10  ;;  %v2724_v35 = vrot.slane %v5298_v26, %v5251_v6  ;;  %v2756_v44 = vrot.slane %v5317_v34, %v5251_v6 }
  0xa1   :  { %4418 = vmatmul.mubr.msk.bf16.vlgmr.msra.gmra.mxu0 %vm1287_vm0, %v4608_v33  ;;  %4419 = vmatmul.mubr.msk.bf16.vlgmr.msra.gmra.mxu1 %vm1287_vm0, %v4608_v33  ;;  %v287_v33 = vld [vmem:[%s5904_s2 + $0x4e8] sm:$0xff] }
  0xa2   :  { %2420 = vmatpush1.bf16.msra.mxu0 %v4382_v14  ;;  %2463 = vmatpush1.bf16.msra.mxu1 %v4384_v15  ;;  %v4389_v32 = vcombine.high %v287_v33, %v319_v28  ;;  %v4388_v40 = vcombine.low %v287_v33, %v319_v28  ;;  %v4326_v14 = vcombine.low %v5209_v57, %v5217_v61  ;;  %v5273_v15 = vsub.s32 6, %v2690_v50 }
  0xa3   :  { %2421 = vmatprep.subr.bf16.mxu0 %v4319_v16  ;;  %2464 = vmatprep.subr.bf16.mxu1 %v4321_v17  ;;  %v5275_v16 = vsub.s32 5, %v2690_v50  ;;  %v5277_v17 = vsub.s32 7, %v2690_v50  ;;  %v2696_v33 = vrot.slane %v5261_v9, %v5265_v11  ;;  %v2704_v28 = vrot.slane %v5261_v9, %v5267_v12 }
  0xa4   :  { %2441 = vmatprep.mubr.bf16.mxu0 %v4520_v8  ;;  %2484 = vmatprep.mubr.bf16.mxu1 %v4520_v8  ;;  %v2780_v50 = vrot.slane %v5317_v34, %v5273_v15  ;;  %v2860_v61 = vrot.slane %v5388_v62, %v5263_v10 }
  0xa5   :  { %v2776_v52 = vrot.slane %v5317_v34, %v5275_v16  ;;  %v2872_v57 = vrot.slane %v5388_v62, %v5275_v16 }
  0xa6   :  { %2422 = vmatpush1.bf16.msra.mxu0 %v4318_v22  ;;  %2465 = vmatpush1.bf16.msra.mxu1 %v4320_v23  ;;  %v4263_v22 = vcombine.high %v5239_v3, %v5244_v4  ;;  %v4264_v23 = vcombine.low %v5249_v5, %v5256_v7 }
  0xa7   :  { %2423 = vmatprep.subr.bf16.mxu0 %v4255_v24  ;;  %2466 = vmatprep.subr.bf16.mxu1 %v4257_v25  ;;  %v4265_v24 = vcombine.high %v5249_v5, %v5256_v7  ;;  %v2692_v25 = vrot.slane %v5261_v9, %v5251_v6 }
  0xaa   :  { %2424 = vmatpush1.bf16.msra.mxu0 %v4254_v29  ;;  %2467 = vmatpush1.bf16.msra.mxu1 %v4256_v30  ;;  %v2708_v29 = vrot.slane %v5261_v9, %v5269_v13  ;;  %v2716_v30 = vrot.slane %v5261_v9, %v5273_v15 }
  0xab   :  { %2505 = vmatprep.subr.bf16.mxu0 %v4387_v31  ;;  %2548 = vmatprep.subr.bf16.mxu1 %v4389_v32  ;;  %v2712_v31 = vrot.slane %v5261_v9, %v5275_v16  ;;  %v2720_v32 = vrot.slane %v5261_v9, %v5277_v17 }
  0xad   :  { %4420 = vmatmul.mubr.msk.bf16.vlgmr.msra.gmra.mxu0 %vm1287_vm0, %v5177_v46  ;;  %4421 = vmatmul.mubr.msk.bf16.vlgmr.msra.gmra.mxu1 %vm1287_vm0, %v5177_v46 }
  0xae   :  { %2506 = vmatpush1.bf16.msra.mxu0 %v4386_v39  ;;  %2549 = vmatpush1.bf16.msra.mxu1 %v4388_v40  ;;  %v2740_v39 = vrot.slane %v5298_v26, %v5269_v13  ;;  %v2748_v40 = vrot.slane %v5298_v26, %v5273_v15 }
  0xaf   :  { %2507 = vmatprep.subr.bf16.mxu0 %v4323_v41  ;;  %2550 = vmatprep.subr.bf16.mxu1 %v4325_v42  ;;  %v2744_v41 = vrot.slane %v5298_v26, %v5275_v16  ;;  %v2752_v42 = vrot.slane %v5298_v26, %v5277_v17 }
  0xb0   :  { %2527 = vmatprep.mubr.bf16.mxu0 %v4520_v8  ;;  %2570 = vmatprep.mubr.bf16.mxu1 %v4520_v8 }
  0xb2   :  { %2508 = vmatpush1.bf16.msra.mxu0 %v4322_v51  ;;  %2551 = vmatpush1.bf16.msra.mxu1 %v4324_v54  ;;  %v5359_v51 = vld [vmem:[%s5905_s3 + $0x20] sm:$0xff] }
  0xb3   :  { %2509 = vmatprep.subr.bf16.mxu0 %v4259_v56  ;;  %2552 = vmatprep.subr.bf16.mxu1 %v4261_v59  ;;  %v2828_v63 = vrot.slane %v5359_v51, %v5263_v10  ;;  %v2868_v59 = vrot.slane %v5388_v62, %v5269_v13  ;;  %v2880_v56 = vrot.slane %v5388_v62, %v5277_v17 }
  0xb6   :  { %2510 = vmatpush1.bf16.msra.mxu0 %v4258_v55  ;;  %2553 = vmatpush1.bf16.msra.mxu1 %v4260_v58  ;;  %v2876_v58 = vrot.slane %v5388_v62, %v5273_v15 }
  0xb7   :  { %2591 = vmatprep.subr.bf16.mxu0 %v4391_v0  ;;  %2634 = vmatprep.subr.bf16.mxu1 %v4393_v2  ;;  %v2824_v0 = vrot.slane %v5359_v51, %v5265_v11  ;;  %v2836_v2 = vrot.slane %v5359_v51, %v5269_v13 }
  0xb9   :  { %4422 = vmatmul.mubr.msk.bf16.vlgmr.msra.gmra.mxu0 %vm1287_vm0, %v5177_v46  ;;  %4423 = vmatmul.mubr.msk.bf16.vlgmr.msra.gmra.mxu1 %vm1287_vm0, %v5177_v46 }
  0xba   :  { %2592 = vmatpush1.bf16.msra.mxu0 %v4390_v60  ;;  %2635 = vmatpush1.bf16.msra.mxu1 %v4392_v1  ;;  %v2832_v1 = vrot.slane %v5359_v51, %v5267_v12  ;;  %v2864_v60 = vrot.slane %v5388_v62, %v5267_v12 }
  0xbb   :  { %2593 = vmatprep.subr.bf16.mxu0 %v4327_v18  ;;  %2636 = vmatprep.subr.bf16.mxu1 %v4329_v20  ;;  %v2840_v18 = vrot.slane %v5359_v51, %v5275_v16  ;;  %v5407_v20 = vld [vmem:[%s5905_s3 + $0x30] sm:$0xff] }
  0xbc   :  { %2613 = vmatprep.mubr.bf16.mxu0 %v4520_v8  ;;  %2656 = vmatprep.mubr.bf16.mxu1 %v4520_v8  ;;  %v2856_v8 = vrot.slane %v5388_v62, %v5265_v11  ;;  %v2884_v3 = vrot.slane %v5407_v20, %v5251_v6  ;;  %v2892_v4 = vrot.slane %v5407_v20, %v5263_v10 }
  0xbd   :  { %v2896_v55 = vrot.slane %v5407_v20, %v5267_v12  ;;  %v2900_v7 = vrot.slane %v5407_v20, %v5269_v13 }
  0xbe   :  { %2594 = vmatpush1.bf16.msra.mxu0 %v4326_v14  ;;  %2637 = vmatpush1.bf16.msra.mxu1 %v4328_v19  ;;  %v2844_v14 = vrot.slane %v5359_v51, %v5273_v15  ;;  %v2848_v19 = vrot.slane %v5359_v51, %v5277_v17 }
  0xbf   :  { %2595 = vmatprep.subr.bf16.mxu0 %v4263_v22  ;;  %2638 = vmatprep.subr.bf16.mxu1 %v4265_v24  ;;  %v5409_v22 = vpop.permute.xlu0 %2678  ;;  %v2852_v24 = vrot.slane %v5388_v62, %v5251_v6 }
  0xc0   :  { %v5445_v62 = vadd.f32 %v2692_v25, %v5409_v22  ;;  %v5451_v5 = vadd.f32 %v2700_v27, %v5409_v22  ;;  %v5463_v25 = vadd.f32 %v2696_v33, %v5409_v22  ;;  %v5469_v27 = vadd.f32 %v2704_v28, %v5409_v22 }
  0xc1   :  { %v5475_v54 = vadd.f32 %v2708_v29, %v5409_v22  ;;  %v5481_v53 = vadd.f32 %v2716_v30, %v5409_v22  ;;  %v5489_v33 = vadd.f32 %v2712_v31, %v5409_v22  ;;  %v5495_v28 = vadd.f32 %v2720_v32, %v5409_v22 }
  0xc2   :  { %2596 = vmatpush1.bf16.msra.mxu0 %v4262_v21  ;;  %2639 = vmatpush1.bf16.msra.mxu1 %v4264_v23  ;;  %v2888_v21 = vrot.slane %v5407_v20, %v5265_v11  ;;  %v2908_v23 = vrot.slane %v5407_v20, %v5273_v15  ;;  %v5501_v29 = vadd.f32 %v2724_v35, %v5409_v22 }
  0xc3   :  { %v5513_v30 = vadd.f32 %v2728_v37, %v5409_v22  ;;  %v5519_v9 = vadd.f32 %v2736_v38, %v5409_v22  ;;  %v5525_v31 = vadd.f32 %v2740_v39, %v5409_v22  ;;  %v5531_v32 = vadd.f32 %v2748_v40, %v5409_v22 }
  0xc4   :  { %v5537_v35 = vadd.f32 %v2744_v41, %v5409_v22  ;;  %v5549_v37 = vadd.f32 %v2756_v44, %v5409_v22  ;;  %v5555_v38 = vadd.f32 %v2764_v45, %v5409_v22  ;;  %v5561_v39 = vadd.f32 %v2760_v47, %v5409_v22 }
  0xc5   :  { %4424 = vmatmul.mubr.msk.bf16.vlgmr.msra.gmra.mxu0 %vm1287_vm0, %v5177_v46  ;;  %4425 = vmatmul.mubr.msk.bf16.vlgmr.msra.gmra.mxu1 %vm1287_vm0, %v5177_v46  ;;  %v5507_v46 = vadd.f32 %v2732_v36, %v5409_v22  ;;  %v5543_v36 = vadd.f32 %v2752_v42, %v5409_v22  ;;  %v5567_v26 = vadd.f32 %v2768_v48, %v5409_v22 }
  0xc6   :  { %v5573_v40 = vadd.f32 %v2772_v49, %v5409_v22  ;;  %v5579_v41 = vadd.f32 %v2780_v50, %v5409_v22  ;;  %v5585_v42 = vadd.f32 %v2776_v52, %v5409_v22  ;;  %v5908_v44 = vrot.slane %v5317_v34, %v5277_v17 }
  0xc7   :  { %v5909_v47 = vrot.slane %v5340_v43, %v5251_v6  ;;  %v5911_v49 = vrot.slane %v5340_v43, %v5263_v10  ;;  %v5913_v52 = vrot.slane %v5340_v43, %v5265_v11  ;;  %v5915_v34 = vrot.slane %v5340_v43, %v5267_v12 }
  0xc8   :  { %5907 = vst [vmem:[#allocation6_spill] sm:$0xff] %v5585_v42  ;;  %v5591_v45 = vadd.f32 %v5908_v44, %v5409_v22 }
  0xc9   :  { %v5597_v48 = vadd.f32 %v5909_v47, %v5409_v22  ;;  %v5603_v50 = vadd.f32 %v5911_v49, %v5409_v22  ;;  %v5609_v42 = vadd.f32 %v5913_v52, %v5409_v22  ;;  %v5615_v44 = vadd.f32 %v5915_v34, %v5409_v22 }
  0xca   :  { %v5917_v47 = vrot.slane %v5340_v43, %v5269_v13  ;;  %v5919_v49 = vrot.slane %v5340_v43, %v5273_v15  ;;  %v5921_v52 = vrot.slane %v5340_v43, %v5275_v16  ;;  %v5923_v34 = vrot.slane %v5340_v43, %v5277_v17 }
  0xcb   :  { %5910 = vst [vmem:[#allocation7_spill] sm:$0xff] %v5597_v48  ;;  %5912 = vst [vmem:[#allocation8_spill] sm:$0xff] %v5603_v50  ;;  %v5660_v43 = vadd.f32 %v2844_v14, %v5409_v22  ;;  %v5681_v14 = vadd.f32 %v2868_v59, %v5409_v22  ;;  %v5701_v59 = vadd.f32 %v2892_v4, %v5409_v22 }
  0xcc   :  { %5914 = vst [vmem:[#allocation9_spill] sm:$0xff] %v5609_v42  ;;  %5916 = vst [vmem:[#allocation10_spill] sm:$0xff] %v5615_v44  ;;  %v5621_v48 = vadd.f32 %v5917_v47, %v5409_v22  ;;  %v5627_v50 = vadd.f32 %v5919_v49, %v5409_v22  ;;  %v5633_v42 = vadd.f32 %v5921_v52, %v5409_v22 }
  0xcd   :  { %v5639_v44 = vadd.f32 %v5923_v34, %v5409_v22  ;;  %v5924_v47 = vrot.slane %v5359_v51, %v5251_v6  ;;  %v5648_v49 = vadd.f32 %v2828_v63, %v5409_v22  ;;  %v5654_v52 = vadd.f32 %v2832_v1, %v5409_v22  ;;  %5930 = vst [vmem:[#allocation19_spill] sm:$0xff] %v5681_v14 }
  0xce   :  { %5918 = vst [vmem:[#allocation11_spill] sm:$0xff] %v5621_v48  ;;  %5920 = vst [vmem:[#allocation12_spill] sm:$0xff] %v5627_v50  ;;  %v5651_v50 = vadd.f32 %v2824_v0, %v5409_v22  ;;  %v5663_v34 = vadd.f32 %v2840_v18, %v5409_v22  ;;  %v5666_v51 = vadd.f32 %v2848_v19, %v5409_v22  ;;  %v5689_v19 = vld [vmem:[%s5905_s3 + $0x38] sm:$0xff]  ;;  %s4522_s3 = smov [#allocation3]  }
  0xcf   :  { %5922 = vst [vmem:[#allocation13_spill] sm:$0xff] %v5633_v42  ;;  %v5645_v48 = vadd.f32 %v5924_v47, %v5409_v22  ;;  %v5657_v42 = vadd.f32 %v2836_v2, %v5409_v22  ;;  %v5669_v63 = vadd.f32 %v2852_v24, %v5409_v22  ;;  %v5672_v0 = vadd.f32 %v2860_v61, %v5409_v22  ;;  %s4184_s16 = sshll.u32 %s4522_s3, 4  ;;  %s4185_s16 = int_to_ptr.vmem [resolvable:$true] %s4184_s16 }
  0xd0   :  { %5925 = vst [vmem:[#allocation14_spill] sm:$0xff] %v5666_v51  ;;  %v5675_v1 = vadd.f32 %v2856_v8, %v5409_v22  ;;  %v5678_v2 = vadd.f32 %v2864_v60, %v5409_v22  ;;  %v5684_v18 = vadd.f32 %v2876_v58, %v5409_v22  ;;  %v5692_v61 = vadd.f32 %v2872_v57, %v5409_v22  ;;  %s4498_s19 = scalar_lea.vmem %s4185_s16, 16  ;;  %s4502_s1 = scalar_lea.vmem %s4185_s16, 32 }
  0xd1   :  { %5926 = vst [vmem:[#allocation15_spill] sm:$0xff] %v5669_v63  ;;  %5927 = vst [vmem:[#allocation16_spill] sm:$0xff] %v5672_v0  ;;  %v5695_v8 = vadd.f32 %v2880_v56, %v5409_v22  ;;  %v5698_v60 = vadd.f32 %v2884_v3, %v5409_v22  ;;  %v1325_v24 = vpop.f32.mrf.mxu0  ;;  %v5704_v58 = vadd.f32 %v2888_v21, %v5409_v22  ;;  %p4499_p0 = scmp.ne.s32.totalorder %s4185_s16, %s4498_s19  ;;  %p4503_p1 = scmp.lt.s32.totalorder %s4185_s16, %s4185_s16 }
  0xd2   :  { %5928 = vst [vmem:[#allocation17_spill] sm:$0xff] %v5675_v1  ;;  %5929 = vst [vmem:[#allocation18_spill] sm:$0xff] %v5678_v2  ;;  %v5707_v47 = vadd.f32 %v2896_v55, %v5409_v22  ;;  %v2904_v57 = vrot.slane %v5407_v20, %v5275_v16  ;;  %v2912_v56 = vrot.slane %v5407_v20, %v5277_v17  ;;  %p4504_p2 = scmp.lt.s32.totalorder %s4502_s1, %s4498_s19 }
  0xd3   :  { %5931 = vst [vmem:[#allocation20_spill] sm:$0xff] %v5684_v18  ;;  %5932 = vst [vmem:[#allocation21_spill] sm:$0xff] %v5692_v61  ;;  %v1368_v61 = vpop.f32.mrf.mxu1  ;;  %v5714_v3 = vadd.f32 %v2900_v7, %v5409_v22  ;;  %v5717_v4 = vadd.f32 %v2908_v23, %v5409_v22  ;;  %v2916_v21 = vrot.slane %v5689_v19, %v5251_v6  ;;  %v1327_v55 = vpop.f32.mrf.mxu0 }
  0xd4   :  { %5933 = vst [vmem:[#allocation22_spill] sm:$0xff] %v5695_v8  ;;  %5934 = vst [vmem:[#allocation23_spill] sm:$0xff] %v5698_v60  ;;  %v3073_v8 = vmul.f32 2.0, %v1325_v24  ;;  %v2928_v20 = vrot.slane %v5689_v19, %v5267_v12  ;;  %v3074_v24 = vmul.f32 2.0, %v1327_v55  ;;  %v2932_v23 = vrot.slane %v5689_v19, %v5269_v13  ;;  %p4505_p3 = por %p4504_p2, %p4503_p1 }
  0xd5   :  { %5935 = vst [vmem:[#allocation24_spill] sm:$0xff] %v5701_v59  ;;  %5936 = vst [vmem:[#allocation25_spill] sm:$0xff] %v5704_v58  ;;  %v3075_v58 = vmul.f32 2.0, %v1368_v61  ;;  %v2920_v59 = vrot.slane %v5689_v19, %v5265_v11  ;;  %v2940_v6 = vrot.slane %v5689_v19, %v5273_v15  ;;  %v5734_v60 = vadd.f32 %v2904_v57, %v5409_v22 }
  0xd6   :  { %5937 = vst [vmem:[#allocation26_spill] sm:$0xff] %v5707_v47  ;;  %5938 = vst [vmem:[#allocation27_spill] sm:$0xff] %v5714_v3  ;;  %v2924_v47 = vrot.slane %v5689_v19, %v5263_v10  ;;  %v3137_v7 = vsub.f32 %v5445_v62, %v3073_v8  ;;  %v1370_v3 = vpop.f32.mrf.mxu1  ;;  %v1329_v10 = vpop.f32.mrf.mxu0  ;;  %v5737_v11 = vadd.f32 %v2912_v56, %v5409_v22  ;;  %p4506_p4 = pnand %p4505_p3, %p4499_p0 }
  0xd7   :  { %5939 = vst [vmem:[#allocation28_spill] sm:$0xff] %v5717_v4  ;;  %v3139_v61 = vsub.f32 %v5451_v5, %v3075_v58  ;;  %v3076_v4 = vmul.f32 2.0, %v1370_v3  ;;  %5940 = vst [vmem:[#allocation29_spill] sm:$0xff] %v5734_v60  ;;  %v3138_v62 = vsub.f32 %v5463_v25, %v3074_v24  ;;  %vm3201_vm1 = vcmp.lt.f32.partialorder %v1329_v10, 0.5 }
  0xd8   :  { %5941 = vst [vmem:[#allocation30_spill] sm:$0xff] %v5737_v11  ;;  %v3521_v12 = vsub.f32 64.0, %v3137_v7  ;;  %v1372_v8 = vpop.f32.mrf.mxu1  ;;  %v5741_v13 = vadd.f32 %v2916_v21, %v5409_v22  ;;  %v4521_v5 = vmov 0.0   ;;  %v1331_v3 = vpop.f32.mrf.mxu0  ;;  %v5746_v57 = vadd.f32 %v2924_v47, %v5409_v22 }
  0xd9   :  { %v3523_v55 = vsub.f32 64.0, %v3139_v61  ;;  %v3140_v15 = vsub.f32 %v5469_v27, %v3076_v4  ;;  %v4426_v58 = vsel %vm3201_vm1, 1.0, %v4521_v5  ;;  %v3393_v56 = vmul.f32 0.5, %v3137_v7 }
  0xda   :  { %5942 = vst [vmem:[#allocation31_spill] sm:$0xff] %v5741_v13  ;;  %5943 = vst [vmem:[#allocation32_spill] sm:$0xff] %v5746_v57  ;;  %v3585_v11 = vmax.f32 %v3521_v12, 0.0  ;;  %v3522_v60 = vsub.f32 64.0, %v3138_v62  ;;  %v5749_v25 = vadd.f32 %v2920_v59, %v5409_v22  ;;  %v3457_v21 = vmul.f32 0.5, %v4426_v58  ;;  %v1374_v13 = vpop.f32.mrf.mxu1 }
  0xdb   :  { %v3587_v24 = vmax.f32 %v3523_v55, 0.0  ;;  %v3524_v10 = vsub.f32 64.0, %v3140_v15  ;;  %vm3203_vm2 = vcmp.lt.f32.partialorder %v1372_v8, 0.5  ;;  %vm3202_vm3 = vcmp.lt.f32.partialorder %v1331_v3, 0.5 }
  0xdc   :  { %5944 = vst [vmem:[#allocation33_spill] sm:$0xff] %v5749_v25  ;;  %v3586_v18 = vmax.f32 %v3522_v60, 0.0  ;;  %v3649_v27 = vsub.f32 %v3585_v11, %v3137_v7  ;;  %v4428_v4 = vsel %vm3203_vm2, 1.0, %v4521_v5  ;;  %v4427_v57 = vsel %vm3202_vm3, 1.0, %v4521_v5 }
  0xdd   :  { %v3588_v14 = vmax.f32 %v3524_v10, 0.0  ;;  %v3459_v2 = vmul.f32 0.5, %v4428_v4  ;;  %v3651_v47 = vsub.f32 %v3587_v24, %v3139_v61  ;;  %v3458_v1 = vmul.f32 0.5, %v4427_v57  ;;  %v1411_v25 = vpop.f32.mrf.mxu0  ;;  %v1454_v3 = vpop.f32.mrf.mxu1 }
  0xde   :  { %v3713_v12 = vmul.f32 %v3649_v27, %v3457_v21  ;;  %v3650_v0 = vsub.f32 %v3586_v18, %v3138_v62  ;;  %vm3204_vm4 = vcmp.lt.f32.partialorder %v1374_v13, 0.5  ;;  %v3395_v59 = vmul.f32 0.5, %v3139_v61 }
  0xdf   :  { %v3394_v55 = vmul.f32 0.5, %v3138_v62  ;;  %v4429_v58 = vsel %vm3204_vm4, 1.0, %v4521_v5  ;;  %v3652_v8 = vsub.f32 %v3588_v14, %v3140_v15  ;;  %v3715_v60 = vmul.f32 %v3651_v47, %v3459_v2  ;;  %v1413_v24 = vpop.f32.mrf.mxu0  ;;  %v1456_v57 = vpop.f32.mrf.mxu1 }
  0xe0   :  { %v3714_v7 = vmul.f32 %v3650_v0, %v3458_v1  ;;  %v3460_v11 = vmul.f32 0.5, %v4429_v58  ;;  %v3077_v63 = vmul.f32 2.0, %v1411_v25  ;;  %v3777_v10 = vadd.f32 %v3713_v12, %v3393_v56 }
  0xe1   :  { %v3079_v4 = vmul.f32 2.0, %v1454_v3  ;;  %v5755_v51 = vadd.f32 %v2928_v20, %v5409_v22  ;;  %v5758_v18 = vadd.f32 %v2932_v23, %v5409_v22  ;;  %v3078_v14 = vmul.f32 2.0, %v1413_v24  ;;  %v1415_v25 = vpop.f32.mrf.mxu0  ;;  %v1458_v47 = vpop.f32.mrf.mxu1 }
  0xe2   :  { %v3778_v61 = vadd.f32 %v3714_v7, %v3394_v55  ;;  %v3716_v62 = vmul.f32 %v3652_v8, %v3460_v11  ;;  %v3141_v13 = vsub.f32 %v5475_v54, %v3077_v63  ;;  %v3396_v2 = vmul.f32 0.5, %v3140_v15 }
  0xe3   :  { %v3143_v0 = vsub.f32 %v5481_v53, %v3079_v4  ;;  %v3080_v1 = vmul.f32 2.0, %v1456_v57  ;;  %v5763_v56 = vadd.f32 %v2940_v6, %v5409_v22  ;;  %v3779_v21 = vadd.f32 %v3715_v60, %v3395_v59  ;;  %v1417_v60 = vpop.f32.mrf.mxu0  ;;  %v1460_v7 = vpop.f32.mrf.mxu1 }
  0xe4   :  { %v4100_v20 = vadd.f32 %v3778_v61, %v3777_v10  ;;  %v3525_v27 = vsub.f32 64.0, %v3141_v13  ;;  %v2936_v23 = vrot.slane %v5689_v19, %v5275_v16  ;;  %v3780_v12 = vadd.f32 %v3716_v62, %v3396_v2 }
  0xe5   :  { %v3527_v55 = vsub.f32 64.0, %v3143_v0  ;;  %v3142_v54 = vsub.f32 %v5489_v33, %v3078_v14  ;;  %v3144_v63 = vsub.f32 %v5495_v28, %v3080_v1  ;;  %v3397_v15 = vmul.f32 0.5, %v3141_v13 }
  0xe6   :  { %v3589_v53 = vmax.f32 %v3525_v27, 0.0  ;;  %vm3205_vm5 = vcmp.lt.f32.partialorder %v1415_v25, 0.5  ;;  %vm3207_vm6 = vcmp.lt.f32.partialorder %v1458_v47, 0.5  ;;  %v4101_v58 = vadd.f32 %v4100_v20, %v3779_v21 }
  0xe7   :  { %v3399_v6 = vmul.f32 0.5, %v3143_v0  ;;  %v3591_v8 = vmax.f32 %v3527_v55, 0.0  ;;  %v3526_v59 = vsub.f32 64.0, %v3142_v54  ;;  %v3398_v11 = vmul.f32 0.5, %v3142_v54 }
  0xe8   :  { %v3528_v3 = vsub.f32 64.0, %v3144_v63  ;;  %v4430_v10 = vsel %vm3205_vm5, 1.0, %v4521_v5  ;;  %v3653_v4 = vsub.f32 %v3589_v53, %v3141_v13  ;;  %v4432_v33 = vsel %vm3207_vm6, 1.0, %v4521_v5 }
  0xe9   :  { %v3590_v24 = vmax.f32 %v3526_v59, 0.0  ;;  %v3461_v61 = vmul.f32 0.5, %v4430_v10  ;;  %v3655_v28 = vsub.f32 %v3591_v8, %v3143_v0  ;;  %v3463_v14 = vmul.f32 0.5, %v4432_v33  ;;  %v1497_v21 = vpop.f32.mrf.mxu0  ;;  %v1540_v55 = vpop.f32.mrf.mxu1 }
  0xea   :  { %v3592_v62 = vmax.f32 %v3528_v3, 0.0  ;;  %vm3206_vm7 = vcmp.lt.f32.partialorder %v1417_v60, 0.5  ;;  %vm3208_vm8 = vcmp.lt.f32.partialorder %v1460_v7, 0.5  ;;  %v4102_v20 = vadd.f32 %v4101_v58, %v3780_v12 }
  0xeb   :  { %v3717_v57 = vmul.f32 %v3653_v4, %v3461_v61  ;;  %v4431_v2 = vsel %vm3206_vm7, 1.0, %v4521_v5  ;;  %v3654_v1 = vsub.f32 %v3590_v24, %v3142_v54  ;;  %v4433_v25 = vsel %vm3208_vm8, 1.0, %v4521_v5  ;;  %v1499_v8 = vpop.f32.mrf.mxu0  ;;  %v1542_v61 = vpop.f32.mrf.mxu1 }
  0xec   :  { %v3462_v27 = vmul.f32 0.5, %v4431_v2  ;;  %v3464_v47 = vmul.f32 0.5, %v4433_v25  ;;  %v3656_v13 = vsub.f32 %v3592_v62, %v3144_v63  ;;  %v3719_v59 = vmul.f32 %v3655_v28, %v3463_v14 }
  0xed   :  { %v3781_v53 = vadd.f32 %v3717_v57, %v3397_v15  ;;  %v3081_v10 = vmul.f32 2.0, %v1497_v21  ;;  %v3083_v0 = vmul.f32 2.0, %v1540_v55  ;;  %v3400_v3 = vmul.f32 0.5, %v3144_v63  ;;  %v1501_v58 = vpop.f32.mrf.mxu0  ;;  %v1544_v15 = vpop.f32.mrf.mxu1 }
  0xee   :  { %v3718_v60 = vmul.f32 %v3654_v1, %v3462_v27  ;;  %v3720_v7 = vmul.f32 %v3656_v13, %v3464_v47  ;;  %v3082_v4 = vmul.f32 2.0, %v1499_v8  ;;  %v3084_v12 = vmul.f32 2.0, %v1542_v61 }
  0xef   :  { %v4103_v33 = vadd.f32 %v4102_v20, %v3781_v53  ;;  %v3145_v54 = vsub.f32 %v5501_v29, %v3081_v10  ;;  %v3147_v24 = vsub.f32 %v5507_v46, %v3083_v0  ;;  %vm3209_vm9 = vcmp.lt.f32.partialorder %v1501_v58, 0.5  ;;  %v1546_v10 = vpop.f32.mrf.mxu1 }
  0xf0   :  { %v3782_v2 = vadd.f32 %v3718_v60, %v3398_v11  ;;  %v3146_v62 = vsub.f32 %v5513_v30, %v3082_v4  ;;  %v2944_v28 = vrot.slane %v5689_v19, %v5277_v17  ;;  %v3783_v63 = vadd.f32 %v3719_v59, %v3399_v6  ;;  %v1503_v30 = vpop.f32.mrf.mxu0 }
  0xf1   :  { %v3784_v14 = vadd.f32 %v3720_v7, %v3400_v3  ;;  %v3529_v57 = vsub.f32 64.0, %v3145_v54  ;;  %v3531_v1 = vsub.f32 64.0, %v3147_v24  ;;  %v3401_v21 = vmul.f32 0.5, %v3145_v54 }
  0xf2   :  { %v4104_v25 = vadd.f32 %v4103_v33, %v3782_v2  ;;  %v3530_v20 = vsub.f32 64.0, %v3146_v62  ;;  %v3148_v29 = vsub.f32 %v5519_v9, %v3084_v12  ;;  %v4434_v11 = vsel %vm3209_vm9, 1.0, %v4521_v5 }
  0xf3   :  { %v3593_v46 = vmax.f32 %v3529_v57, 0.0  ;;  %v3595_v27 = vmax.f32 %v3531_v1, 0.0  ;;  %vm3211_vm10 = vcmp.lt.f32.partialorder %v1544_v15, 0.5  ;;  %v3403_v13 = vmul.f32 0.5, %v3147_v24 }
  0xf4   :  { %v4105_v47 = vadd.f32 %v4104_v25, %v3783_v63  ;;  %v3594_v55 = vmax.f32 %v3530_v20, 0.0  ;;  %v3532_v53 = vsub.f32 64.0, %v3148_v29  ;;  %v3465_v6 = vmul.f32 0.5, %v4434_v11 }
  0xf5   :  { %v3657_v59 = vsub.f32 %v3593_v46, %v3145_v54  ;;  %v4436_v0 = vsel %vm3211_vm10, 1.0, %v4521_v5  ;;  %v3659_v8 = vsub.f32 %v3595_v27, %v3147_v24  ;;  %vm3210_vm11 = vcmp.lt.f32.partialorder %v1503_v30, 0.5  ;;  %v1583_v33 = vpop.f32.mrf.mxu0  ;;  %v1626_v63 = vpop.f32.mrf.mxu1 }
  0xf6   :  { %v4106_v3 = vadd.f32 %v4105_v47, %v3784_v14  ;;  %v3596_v60 = vmax.f32 %v3532_v53, 0.0  ;;  %v3467_v7 = vmul.f32 0.5, %v4436_v0  ;;  %v4435_v4 = vsel %vm3210_vm11, 1.0, %v4521_v5 }
  0xf7   :  { %v3721_v9 = vmul.f32 %v3657_v59, %v3465_v6  ;;  %v3658_v61 = vsub.f32 %v3594_v55, %v3146_v62  ;;  %vm3212_vm12 = vcmp.lt.f32.partialorder %v1546_v10, 0.5  ;;  %v3466_v58 = vmul.f32 0.5, %v4435_v4  ;;  %v1585_v14 = vpop.f32.mrf.mxu0  ;;  %v1628_v11 = vpop.f32.mrf.mxu1 }
  0xf8   :  { %v3723_v12 = vmul.f32 %v3659_v8, %v3467_v7  ;;  %v4437_v2 = vsel %vm3212_vm12, 1.0, %v4521_v5  ;;  %v3660_v15 = vsub.f32 %v3596_v60, %v3148_v29  ;;  %v3085_v1 = vmul.f32 2.0, %v1583_v33 }
  0xf9   :  { %v3785_v54 = vadd.f32 %v3721_v9, %v3401_v21  ;;  %v3468_v57 = vmul.f32 0.5, %v4437_v2  ;;  %v3087_v24 = vmul.f32 2.0, %v1626_v63  ;;  %v3402_v25 = vmul.f32 0.5, %v3146_v62  ;;  %v1587_v10 = vpop.f32.mrf.mxu0  ;;  %v1630_v0 = vpop.f32.mrf.mxu1 }
  0xfa   :  { %v3404_v20 = vmul.f32 0.5, %v3148_v29  ;;  %v3722_v46 = vmul.f32 %v3658_v61, %v3466_v58  ;;  %v3086_v27 = vmul.f32 2.0, %v1585_v14  ;;  %v3149_v55 = vsub.f32 %v5525_v31, %v3085_v1 }
  0xfb   :  { %v4107_v30 = vadd.f32 %v4106_v3, %v3785_v54  ;;  %v3724_v47 = vmul.f32 %v3660_v15, %v3468_v57  ;;  %v3151_v53 = vsub.f32 %v5531_v32, %v3087_v24  ;;  %v3088_v21 = vmul.f32 2.0, %v1628_v11  ;;  %v1589_v33 = vpop.f32.mrf.mxu0  ;;  %v1632_v57 = vpop.f32.mrf.mxu1 }
  0xfc   :  { %v3786_v6 = vadd.f32 %v3722_v46, %v3402_v25  ;;  %v3150_v59 = vsub.f32 %v5537_v35, %v3086_v27  ;;  %vm3213_vm13 = vcmp.lt.f32.partialorder %v1587_v10, 0.5  ;;  %v3787_v8 = vadd.f32 %v3723_v12, %v3403_v13 }
  0xfd   :  { %v3788_v60 = vadd.f32 %v3724_v47, %v3404_v20  ;;  %v3405_v62 = vmul.f32 0.5, %v3149_v55  ;;  %v3533_v29 = vsub.f32 64.0, %v3149_v55  ;;  %v3407_v9 = vmul.f32 0.5, %v3151_v53 }
  0xfe   :  { %v4108_v7 = vadd.f32 %v4107_v30, %v3786_v6  ;;  %v3535_v4 = vsub.f32 64.0, %v3151_v53  ;;  %v3534_v3 = vsub.f32 64.0, %v3150_v59  ;;  %v3152_v31 = vsub.f32 %v5543_v36, %v3088_v21 }
  0xff   :  { %v3597_v61 = vmax.f32 %v3533_v29, 0.0  ;;  %v4438_v32 = vsel %vm3213_vm13, 1.0, %v4521_v5  ;;  %vm3215_vm14 = vcmp.lt.f32.partialorder %v1630_v0, 0.5  ;;  %v3406_v2 = vmul.f32 0.5, %v3150_v59 }
 0x100   :  { %v4109_v58 = vadd.f32 %v4108_v7, %v3787_v8  ;;  %v3599_v35 = vmax.f32 %v3535_v4, 0.0  ;;  %v3598_v15 = vmax.f32 %v3534_v3, 0.0  ;;  %v3536_v63 = vsub.f32 64.0, %v3152_v31 }
 0x101   :  { %v3469_v13 = vmul.f32 0.5, %v4438_v32  ;;  %v3661_v12 = vsub.f32 %v3597_v61, %v3149_v55  ;;  %v4440_v54 = vsel %vm3215_vm14, 1.0, %v4521_v5  ;;  %vm3214_vm15 = vcmp.lt.f32.partialorder %v1589_v33, 0.5  ;;  %v1669_v27 = vpop.f32.mrf.mxu0  ;;  %v1712_v10 = vpop.f32.mrf.mxu1 }
 0x102   :  { %v4110_v1 = vadd.f32 %v4109_v58, %v3788_v60  ;;  %v3471_v24 = vmul.f32 0.5, %v4440_v54  ;;  %v3663_v14 = vsub.f32 %v3599_v35, %v3151_v53  ;;  %v3600_v25 = vmax.f32 %v3536_v63, 0.0 }
 0x103   :  { %v3725_v36 = vmul.f32 %v3661_v12, %v3469_v13  ;;  %v4439_v20 = vsel %vm3214_vm15, 1.0, %v4521_v5  ;;  %v3662_v46 = vsub.f32 %v3598_v15, %v3150_v59  ;;  %vm3216_vm0 = vcmp.lt.f32.partialorder %v1632_v57, 0.5  ;;  %v1671_v8 = vpop.f32.mrf.mxu0  ;;  %v1714_v4 = vpop.f32.mrf.mxu1 }
 0x104   :  { %v3727_v11 = vmul.f32 %v3663_v14, %v3471_v24  ;;  %v3470_v30 = vmul.f32 0.5, %v4439_v20  ;;  %v3089_v47 = vmul.f32 2.0, %v1669_v27  ;;  %v4441_v55 = vsel %vm3216_vm0, 1.0, %v4521_v5 }
 0x105   :  { %v3789_v6 = vadd.f32 %v3725_v36, %v3405_v62  ;;  %v3664_v21 = vsub.f32 %v3600_v25, %v3152_v31  ;;  %v3091_v0 = vmul.f32 2.0, %v1712_v10  ;;  %v3408_v60 = vmul.f32 0.5, %v3152_v31  ;;  %v1673_v33 = vpop.f32.mrf.mxu0  ;;  %v1716_v54 = vpop.f32.mrf.mxu1 }
 0x106   :  { %v3726_v53 = vmul.f32 %v3662_v46, %v3470_v30  ;;  %v3472_v29 = vmul.f32 0.5, %v4441_v55  ;;  %v3153_v7 = vsub.f32 %v5549_v37, %v3089_v47  ;;  %v3090_v61 = vmul.f32 2.0, %v1671_v8 }
 0x107   :  { %v4111_v3 = vadd.f32 %v4110_v1, %v3789_v6  ;;  %v3155_v59 = vsub.f32 %v5555_v38, %v3091_v0  ;;  %v3092_v32 = vmul.f32 2.0, %v1714_v4  ;;  %v3791_v58 = vadd.f32 %v3727_v11, %v3407_v9  ;;  %v1675_v36 = vpop.f32.mrf.mxu0 }
 0x108   :  { %v3790_v35 = vadd.f32 %v3726_v53, %v3406_v2  ;;  %v3728_v62 = vmul.f32 %v3664_v21, %v3472_v29  ;;  %v3537_v15 = vsub.f32 64.0, %v3153_v7  ;;  %v3409_v63 = vmul.f32 0.5, %v3153_v7 }
 0x109   :  { %v3539_v13 = vsub.f32 64.0, %v3155_v59  ;;  %v3154_v12 = vsub.f32 %v5561_v39, %v3090_v61  ;;  %v3156_v31 = vsub.f32 %v5567_v26, %v3092_v32  ;;  %v3411_v24 = vmul.f32 0.5, %v3155_v59  ;;  %v1718_v26 = vpop.f32.mrf.mxu1 }
 0x10a   :  { %v4112_v57 = vadd.f32 %v4111_v3, %v3790_v35  ;;  %v3601_v37 = vmax.f32 %v3537_v15, 0.0  ;;  %vm3217_vm1 = vcmp.lt.f32.partialorder %v1673_v33, 0.5  ;;  %v3792_v1 = vadd.f32 %v3728_v62, %v3408_v60 }
 0x10b   :  { %v3603_v38 = vmax.f32 %v3539_v13, 0.0  ;;  %v3410_v14 = vmul.f32 0.5, %v3154_v12  ;;  %v3538_v25 = vsub.f32 64.0, %v3154_v12  ;;  %v3540_v2 = vsub.f32 64.0, %v3156_v31 }
 0x10c   :  { %v4113_v9 = vadd.f32 %v4112_v57, %v3791_v58  ;;  %v4442_v20 = vsel %vm3217_vm1, 1.0, %v4521_v5  ;;  %v3665_v46 = vsub.f32 %v3601_v37, %v3153_v7  ;;  %vm3219_vm2 = vcmp.lt.f32.partialorder %v1716_v54, 0.5 }
 0x10d   :  { %v3602_v27 = vmax.f32 %v3538_v25, 0.0  ;;  %v3473_v11 = vmul.f32 0.5, %v4442_v20  ;;  %v3667_v39 = vsub.f32 %v3603_v38, %v3155_v59  ;;  %v3604_v47 = vmax.f32 %v3540_v2, 0.0  ;;  %v1755_v8 = vpop.f32.mrf.mxu0  ;;  %v1798_v7 = vpop.f32.mrf.mxu1 }
 0x10e   :  { %v4114_v30 = vadd.f32 %v4113_v9, %v3792_v1  ;;  %v4444_v10 = vsel %vm3219_vm2, 1.0, %v4521_v5  ;;  %vm3218_vm3 = vcmp.lt.f32.partialorder %v1675_v36, 0.5  ;;  %vm3220_vm4 = vcmp.lt.f32.partialorder %v1718_v26, 0.5 }
 0x10f   :  { %v3729_v6 = vmul.f32 %v3665_v46, %v3473_v11  ;;  %v3475_v55 = vmul.f32 0.5, %v4444_v10  ;;  %v4443_v21 = vsel %vm3218_vm3, 1.0, %v4521_v5  ;;  %v3666_v0 = vsub.f32 %v3602_v27, %v3154_v12  ;;  %v1757_v32 = vpop.f32.mrf.mxu0  ;;  %v1800_v15 = vpop.f32.mrf.mxu1 }
 0x110   :  { %v3474_v60 = vmul.f32 0.5, %v4443_v21  ;;  %v3668_v53 = vsub.f32 %v3604_v47, %v3156_v31  ;;  %v3093_v29 = vmul.f32 2.0, %v1755_v8  ;;  %v4445_v59 = vsel %vm3220_vm4, 1.0, %v4521_v5 }
 0x111   :  { %v3793_v4 = vadd.f32 %v3729_v6, %v3409_v63  ;;  %v3731_v3 = vmul.f32 %v3667_v39, %v3475_v55  ;;  %v3095_v61 = vmul.f32 2.0, %v1798_v7  ;;  %v3476_v58 = vmul.f32 0.5, %v4445_v59  ;;  %v1759_v57 = vpop.f32.mrf.mxu0  ;;  %v1802_v46 = vpop.f32.mrf.mxu1 }
 0x112   :  { %v3730_v33 = vmul.f32 %v3666_v0, %v3474_v60  ;;  %v3157_v35 = vsub.f32 %v5573_v40, %v3093_v29  ;;  %v3094_v62 = vmul.f32 2.0, %v1757_v32  ;;  %v3096_v54 = vmul.f32 2.0, %v1800_v15  ;;  %v5945_v40 = vld [vmem:[#allocation6_spill] sm:$0xff] }
 0x113   :  { %v4115_v13 = vadd.f32 %v4114_v30, %v3793_v4  ;;  %v3159_v12 = vsub.f32 %v5579_v41, %v3095_v61  ;;  %v5805_v63 = vadd.f32 %v2936_v23, %v5409_v22  ;;  %v3412_v37 = vmul.f32 0.5, %v3156_v31  ;;  %v1761_v30 = vpop.f32.mrf.mxu0 }
 0x114   :  { %v3794_v1 = vadd.f32 %v3730_v33, %v3410_v14  ;;  %v3732_v38 = vmul.f32 %v3668_v53, %v3476_v58  ;;  %v3541_v25 = vsub.f32 64.0, %v3157_v35  ;;  %v3795_v36 = vadd.f32 %v3731_v3, %v3411_v24 }
 0x115   :  { %v3543_v9 = vsub.f32 64.0, %v3159_v12  ;;  %v3158_v2 = vsub.f32 %v5945_v40, %v3094_v62  ;;  %v3160_v20 = vsub.f32 %v5591_v45, %v3096_v54  ;;  %v3413_v27 = vmul.f32 0.5, %v3157_v35  ;;  %v1804_v45 = vpop.f32.mrf.mxu1 }
 0x116   :  { %v4116_v41 = vadd.f32 %v4115_v13, %v3794_v1  ;;  %v3605_v11 = vmax.f32 %v3541_v25, 0.0  ;;  %vm3221_vm5 = vcmp.lt.f32.partialorder %v1759_v57, 0.5  ;;  %v3796_v39 = vadd.f32 %v3732_v38, %v3412_v37  ;;  %v5946_v57 = vld [vmem:[#allocation7_spill] sm:$0xff] }
 0x117   :  { %v3607_v26 = vmax.f32 %v3543_v9, 0.0  ;;  %v3414_v16 = vmul.f32 0.5, %v3158_v2  ;;  %v3542_v23 = vsub.f32 64.0, %v3158_v2  ;;  %v3544_v14 = vsub.f32 64.0, %v3160_v20  ;;  %v5947_v9 = vld [vmem:[#allocation8_spill] sm:$0xff] }
 0x118   :  { %v4117_v31 = vadd.f32 %v4116_v41, %v3795_v36  ;;  %v4446_v47 = vsel %vm3221_vm5, 1.0, %v4521_v5  ;;  %v3669_v24 = vsub.f32 %v3605_v11, %v3157_v35  ;;  %vm3223_vm6 = vcmp.lt.f32.partialorder %v1802_v46, 0.5 }
 0x119   :  { %v3606_v10 = vmax.f32 %v3542_v23, 0.0  ;;  %v3477_v6 = vmul.f32 0.5, %v4446_v47  ;;  %v3671_v55 = vsub.f32 %v3607_v26, %v3159_v12  ;;  %v3608_v0 = vmax.f32 %v3544_v14, 0.0  ;;  %v1841_v4 = vpop.f32.mrf.mxu0  ;;  %v1884_v32 = vpop.f32.mrf.mxu1  ;;  %v5949_v14 = vld [vmem:[#allocation10_spill] sm:$0xff] }
 0x11a   :  { %v4118_v21 = vadd.f32 %v4117_v31, %v3796_v39  ;;  %v4448_v8 = vsel %vm3223_vm6, 1.0, %v4521_v5  ;;  %vm3222_vm7 = vcmp.lt.f32.partialorder %v1761_v30, 0.5  ;;  %vm3224_vm8 = vcmp.lt.f32.partialorder %v1804_v45, 0.5  ;;  %v5948_v30 = vld [vmem:[#allocation9_spill] sm:$0xff] }
 0x11b   :  { %v3733_v60 = vmul.f32 %v3669_v24, %v3477_v6  ;;  %v3479_v53 = vmul.f32 0.5, %v4448_v8  ;;  %v4447_v29 = vsel %vm3222_vm7, 1.0, %v4521_v5  ;;  %v3670_v7 = vsub.f32 %v3606_v10, %v3158_v2  ;;  %v1843_v15 = vpop.f32.mrf.mxu0  ;;  %v1886_v38 = vpop.f32.mrf.mxu1 }
 0x11c   :  { %v3478_v3 = vmul.f32 0.5, %v4447_v29  ;;  %v3672_v59 = vsub.f32 %v3608_v0, %v3160_v20  ;;  %v3097_v61 = vmul.f32 2.0, %v1841_v4  ;;  %v4449_v35 = vsel %vm3224_vm8, 1.0, %v4521_v5 }
 0x11d   :  { %v3797_v33 = vadd.f32 %v3733_v60, %v3413_v27  ;;  %v3735_v58 = vmul.f32 %v3671_v55, %v3479_v53  ;;  %v3099_v62 = vmul.f32 2.0, %v1884_v32  ;;  %v3480_v54 = vmul.f32 0.5, %v4449_v35  ;;  %v1845_v46 = vpop.f32.mrf.mxu0  ;;  %v1888_v24 = vpop.f32.mrf.mxu1 }
 0x11e   :  { %v3734_v13 = vmul.f32 %v3670_v7, %v3478_v3  ;;  %v3161_v37 = vsub.f32 %v5946_v57, %v3097_v61  ;;  %v3098_v1 = vmul.f32 2.0, %v1843_v15  ;;  %v3415_v25 = vmul.f32 0.5, %v3159_v12 }
 0x11f   :  { %v4119_v36 = vadd.f32 %v4118_v21, %v3797_v33  ;;  %v3163_v40 = vsub.f32 %v5947_v9, %v3099_v62  ;;  %v3100_v2 = vmul.f32 2.0, %v1886_v38  ;;  %v3416_v41 = vmul.f32 0.5, %v3160_v20  ;;  %v1847_v8 = vpop.f32.mrf.mxu0  ;;  %v1890_v3 = vpop.f32.mrf.mxu1 }
 0x120   :  { %v3798_v11 = vadd.f32 %v3734_v13, %v3414_v16  ;;  %v3736_v27 = vmul.f32 %v3672_v59, %v3480_v54  ;;  %v3545_v39 = vsub.f32 64.0, %v3161_v37  ;;  %v3799_v26 = vadd.f32 %v3735_v58, %v3415_v25 }
 0x121   :  { %v3547_v23 = vsub.f32 64.0, %v3163_v40  ;;  %v3162_v31 = vsub.f32 %v5948_v30, %v3098_v1  ;;  %v3164_v47 = vsub.f32 %v5949_v14, %v3100_v2  ;;  %v3417_v6 = vmul.f32 0.5, %v3161_v37  ;;  %v5951_v30 = vld [vmem:[#allocation12_spill] sm:$0xff] }
 0x122   :  { %v4120_v10 = vadd.f32 %v4119_v36, %v3798_v11  ;;  %v3609_v55 = vmax.f32 %v3545_v39, 0.0  ;;  %vm3225_vm9 = vcmp.lt.f32.partialorder %v1845_v46, 0.5  ;;  %v3800_v12 = vadd.f32 %v3736_v27, %v3416_v41  ;;  %v5950_v41 = vld [vmem:[#allocation11_spill] sm:$0xff] }
 0x123   :  { %v3611_v45 = vmax.f32 %v3547_v23, 0.0  ;;  %v3418_v21 = vmul.f32 0.5, %v3162_v31  ;;  %v3546_v0 = vsub.f32 64.0, %v3162_v31  ;;  %v3548_v16 = vsub.f32 64.0, %v3164_v47 }
 0x124   :  { %v4121_v20 = vadd.f32 %v4120_v10, %v3799_v26  ;;  %v4450_v60 = vsel %vm3225_vm9, 1.0, %v4521_v5  ;;  %v3673_v53 = vsub.f32 %v3609_v55, %v3161_v37  ;;  %vm3227_vm10 = vcmp.lt.f32.partialorder %v1888_v24, 0.5 }
 0x125   :  { %v3610_v29 = vmax.f32 %v3546_v0, 0.0  ;;  %v3481_v7 = vmul.f32 0.5, %v4450_v60  ;;  %v3675_v4 = vsub.f32 %v3611_v45, %v3163_v40  ;;  %v3612_v61 = vmax.f32 %v3548_v16, 0.0  ;;  %v1927_v15 = vpop.f32.mrf.mxu0  ;;  %v1970_v37 = vpop.f32.mrf.mxu1 }
 0x126   :  { %v4122_v59 = vadd.f32 %v4121_v20, %v3800_v12  ;;  %v4452_v32 = vsel %vm3227_vm10, 1.0, %v4521_v5  ;;  %vm3226_vm11 = vcmp.lt.f32.partialorder %v1847_v8, 0.5  ;;  %vm3228_vm12 = vcmp.lt.f32.partialorder %v1890_v3, 0.5  ;;  %v5952_v8 = vld [vmem:[#allocation13_spill] sm:$0xff] }
 0x127   :  { %v3737_v33 = vmul.f32 %v3673_v53, %v3481_v7  ;;  %v3483_v58 = vmul.f32 0.5, %v4452_v32  ;;  %v4451_v35 = vsel %vm3226_vm11, 1.0, %v4521_v5  ;;  %v3674_v62 = vsub.f32 %v3610_v29, %v3162_v31  ;;  %v1929_v9 = vpop.f32.mrf.mxu0  ;;  %v1972_v39 = vpop.f32.mrf.mxu1 }
 0x128   :  { %v3482_v13 = vmul.f32 0.5, %v4451_v35  ;;  %v3676_v54 = vsub.f32 %v3612_v61, %v3164_v47  ;;  %v3101_v57 = vmul.f32 2.0, %v1927_v15  ;;  %v4453_v25 = vsel %vm3228_vm12, 1.0, %v4521_v5 }
 0x129   :  { %v3801_v1 = vadd.f32 %v3737_v33, %v3417_v6  ;;  %v3739_v38 = vmul.f32 %v3675_v4, %v3483_v58  ;;  %v3103_v36 = vmul.f32 2.0, %v1970_v37  ;;  %v3484_v46 = vmul.f32 0.5, %v4453_v25  ;;  %v1931_v24 = vpop.f32.mrf.mxu0  ;;  %v1974_v60 = vpop.f32.mrf.mxu1 }
 0x12a   :  { %v3738_v2 = vmul.f32 %v3674_v62, %v3482_v13  ;;  %v3165_v11 = vsub.f32 %v5950_v41, %v3101_v57  ;;  %v3102_v27 = vmul.f32 2.0, %v1929_v9  ;;  %v3419_v26 = vmul.f32 0.5, %v3163_v40 }
 0x12b   :  { %v4123_v23 = vadd.f32 %v4122_v59, %v3801_v1  ;;  %v3167_v31 = vsub.f32 %v5951_v30, %v3103_v36  ;;  %v3104_v14 = vmul.f32 2.0, %v1972_v39  ;;  %v3420_v10 = vmul.f32 0.5, %v3164_v47  ;;  %v1933_v61 = vpop.f32.mrf.mxu0 }
 0x12c   :  { %v3802_v55 = vadd.f32 %v3738_v2, %v3418_v21  ;;  %v3740_v6 = vmul.f32 %v3676_v54, %v3484_v46  ;;  %v3549_v12 = vsub.f32 64.0, %v3165_v11  ;;  %v3803_v45 = vadd.f32 %v3739_v38, %v3419_v26 }
 0x12d   :  { %v3551_v0 = vsub.f32 64.0, %v3167_v31  ;;  %v3166_v20 = vsub.f32 %v5952_v8, %v3102_v27  ;;  %v3168_v16 = vsub.f32 %v5639_v44, %v3104_v14  ;;  %v3421_v29 = vmul.f32 0.5, %v3165_v11  ;;  %v1976_v44 = vpop.f32.mrf.mxu1 }
 0x12e   :  { %v4124_v53 = vadd.f32 %v4123_v23, %v3802_v55  ;;  %v3613_v7 = vmax.f32 %v3549_v12, 0.0  ;;  %vm3229_vm13 = vcmp.lt.f32.partialorder %v1931_v24, 0.5  ;;  %v3804_v40 = vadd.f32 %v3740_v6, %v3420_v10 }
 0x12f   :  { %v3615_v4 = vmax.f32 %v3551_v0, 0.0  ;;  %v3422_v3 = vmul.f32 0.5, %v3166_v20  ;;  %v3550_v59 = vsub.f32 64.0, %v3166_v20  ;;  %v3552_v21 = vsub.f32 64.0, %v3168_v16 }
 0x130   :  { %v4125_v47 = vadd.f32 %v4124_v53, %v3803_v45  ;;  %v4454_v32 = vsel %vm3229_vm13, 1.0, %v4521_v5  ;;  %v3677_v33 = vsub.f32 %v3613_v7, %v3165_v11  ;;  %vm3231_vm14 = vcmp.lt.f32.partialorder %v1974_v60, 0.5 }
 0x131   :  { %v3614_v58 = vmax.f32 %v3550_v59, 0.0  ;;  %v3485_v35 = vmul.f32 0.5, %v4454_v32  ;;  %v3679_v62 = vsub.f32 %v3615_v4, %v3167_v31  ;;  %v3616_v13 = vmax.f32 %v3552_v21, 0.0  ;;  %v2013_v25 = vpop.f32.mrf.mxu0  ;;  %v2056_v46 = vpop.f32.mrf.mxu1 }
 0x132   :  { %v4126_v15 = vadd.f32 %v4125_v47, %v3804_v40  ;;  %v4456_v54 = vsel %vm3231_vm14, 1.0, %v4521_v5  ;;  %vm3230_vm15 = vcmp.lt.f32.partialorder %v1933_v61, 0.5  ;;  %vm3232_vm0 = vcmp.lt.f32.partialorder %v1976_v44, 0.5 }
 0x133   :  { %v3741_v57 = vmul.f32 %v3677_v33, %v3485_v35  ;;  %v3487_v37 = vmul.f32 0.5, %v4456_v54  ;;  %v4455_v1 = vsel %vm3230_vm15, 1.0, %v4521_v5  ;;  %v3678_v38 = vsub.f32 %v3614_v58, %v3166_v20  ;;  %v2015_v26 = vpop.f32.mrf.mxu0  ;;  %v2058_v10 = vpop.f32.mrf.mxu1 }
 0x134   :  { %v3486_v36 = vmul.f32 0.5, %v4455_v1  ;;  %v3680_v9 = vsub.f32 %v3616_v13, %v3168_v16  ;;  %v3105_v2 = vmul.f32 2.0, %v2013_v25  ;;  %v4457_v27 = vsel %vm3232_vm0, 1.0, %v4521_v5 }
 0x135   :  { %v3805_v41 = vadd.f32 %v3741_v57, %v3421_v29  ;;  %v3743_v11 = vmul.f32 %v3679_v62, %v3487_v37  ;;  %v3107_v39 = vmul.f32 2.0, %v2056_v46  ;;  %v3488_v30 = vmul.f32 0.5, %v4457_v27  ;;  %v2017_v0 = vpop.f32.mrf.mxu0  ;;  %v2060_v59 = vpop.f32.mrf.mxu1 }
 0x136   :  { %v3742_v23 = vmul.f32 %v3678_v38, %v3486_v36  ;;  %v3169_v14 = vsub.f32 %v5645_v48, %v3105_v2  ;;  %v3106_v24 = vmul.f32 2.0, %v2015_v26  ;;  %v3423_v55 = vmul.f32 0.5, %v3167_v31 }
 0x137   :  { %v4127_v6 = vadd.f32 %v4126_v15, %v3805_v41  ;;  %v3171_v12 = vsub.f32 %v5648_v49, %v3107_v39  ;;  %v3108_v45 = vmul.f32 2.0, %v2058_v10  ;;  %v3424_v8 = vmul.f32 0.5, %v3168_v16  ;;  %v2019_v33 = vpop.f32.mrf.mxu0 }
 0x138   :  { %v3806_v20 = vadd.f32 %v3742_v23, %v3422_v3  ;;  %v3744_v60 = vmul.f32 %v3680_v9, %v3488_v30  ;;  %v3553_v53 = vsub.f32 64.0, %v3169_v14  ;;  %v3807_v29 = vadd.f32 %v3743_v11, %v3423_v55 }
 0x139   :  { %v3555_v7 = vsub.f32 64.0, %v3171_v12  ;;  %v3170_v40 = vsub.f32 %v5651_v50, %v3106_v24  ;;  %v3172_v4 = vsub.f32 %v5654_v52, %v3108_v45  ;;  %v3425_v61 = vmul.f32 0.5, %v3169_v14  ;;  %v2062_v52 = vpop.f32.mrf.mxu1 }
 0x13a   :  { %v4128_v48 = vadd.f32 %v4127_v6, %v3806_v20  ;;  %v3617_v47 = vmax.f32 %v3553_v53, 0.0  ;;  %vm3233_vm1 = vcmp.lt.f32.partialorder %v2017_v0, 0.5  ;;  %v3808_v31 = vadd.f32 %v3744_v60, %v3424_v8 }
 0x13b   :  { %v3619_v21 = vmax.f32 %v3555_v7, 0.0  ;;  %v3426_v49 = vmul.f32 0.5, %v3170_v40  ;;  %v3554_v32 = vsub.f32 64.0, %v3170_v40  ;;  %v3556_v3 = vsub.f32 64.0, %v3172_v4 }
 0x13c   :  { %v4129_v16 = vadd.f32 %v4128_v48, %v3807_v29  ;;  %v4458_v58 = vsel %vm3233_vm1, 1.0, %v4521_v5  ;;  %v3681_v35 = vsub.f32 %v3617_v47, %v3169_v14  ;;  %vm3235_vm2 = vcmp.lt.f32.partialorder %v2060_v59, 0.5  ;;  %v5953_v48 = vld [vmem:[#allocation14_spill] sm:$0xff] }
 0x13d   :  { %v3618_v62 = vmax.f32 %v3554_v32, 0.0  ;;  %v3489_v44 = vmul.f32 0.5, %v4458_v58  ;;  %v3683_v50 = vsub.f32 %v3619_v21, %v3171_v12  ;;  %v3620_v13 = vmax.f32 %v3556_v3, 0.0  ;;  %v2099_v25 = vpop.f32.mrf.mxu0  ;;  %v2142_v46 = vpop.f32.mrf.mxu1 }
 0x13e   :  { %v4130_v15 = vadd.f32 %v4129_v16, %v3808_v31  ;;  %v4460_v54 = vsel %vm3235_vm2, 1.0, %v4521_v5  ;;  %vm3234_vm3 = vcmp.lt.f32.partialorder %v2019_v33, 0.5  ;;  %vm3236_vm4 = vcmp.lt.f32.partialorder %v2062_v52, 0.5 }
 0x13f   :  { %v3745_v57 = vmul.f32 %v3681_v35, %v3489_v44  ;;  %v3491_v37 = vmul.f32 0.5, %v4460_v54  ;;  %v4459_v1 = vsel %vm3234_vm3, 1.0, %v4521_v5  ;;  %v3682_v38 = vsub.f32 %v3618_v62, %v3170_v40  ;;  %v2101_v26 = vpop.f32.mrf.mxu0  ;;  %v2144_v10 = vpop.f32.mrf.mxu1 }
 0x140   :  { %v3490_v36 = vmul.f32 0.5, %v4459_v1  ;;  %v3684_v9 = vsub.f32 %v3620_v13, %v3172_v4  ;;  %v3109_v2 = vmul.f32 2.0, %v2099_v25  ;;  %v4461_v27 = vsel %vm3236_vm4, 1.0, %v4521_v5 }
 0x141   :  { %v3809_v41 = vadd.f32 %v3745_v57, %v3425_v61  ;;  %v3747_v11 = vmul.f32 %v3683_v50, %v3491_v37  ;;  %v3111_v39 = vmul.f32 2.0, %v2142_v46  ;;  %v3492_v30 = vmul.f32 0.5, %v4461_v27  ;;  %v2103_v8 = vpop.f32.mrf.mxu0  ;;  %v2146_v47 = vpop.f32.mrf.mxu1 }
 0x142   :  { %v3746_v23 = vmul.f32 %v3682_v38, %v3490_v36  ;;  %v3173_v14 = vsub.f32 %v5657_v42, %v3109_v2  ;;  %v3110_v24 = vmul.f32 2.0, %v2101_v26  ;;  %v3427_v55 = vmul.f32 0.5, %v3171_v12 }
 0x143   :  { %v4131_v6 = vadd.f32 %v4130_v15, %v3809_v41  ;;  %v3175_v45 = vsub.f32 %v5660_v43, %v3111_v39  ;;  %v3112_v0 = vmul.f32 2.0, %v2144_v10  ;;  %v3428_v20 = vmul.f32 0.5, %v3172_v4  ;;  %v2105_v16 = vpop.f32.mrf.mxu0  ;;  %v2148_v44 = vpop.f32.mrf.mxu1 }
 0x144   :  { %v3810_v60 = vadd.f32 %v3746_v23, %v3426_v49  ;;  %v3748_v53 = vmul.f32 %v3684_v9, %v3492_v30  ;;  %v3557_v29 = vsub.f32 64.0, %v3173_v14  ;;  %v3811_v7 = vadd.f32 %v3747_v11, %v3427_v55  ;;  %v5954_v23 = vld [vmem:[#allocation15_spill] sm:$0xff] }
 0x145   :  { %v3559_v40 = vsub.f32 64.0, %v3175_v45  ;;  %v3174_v59 = vsub.f32 %v5663_v34, %v3110_v24  ;;  %v3176_v61 = vsub.f32 %v5953_v48, %v3112_v0  ;;  %v3429_v31 = vmul.f32 0.5, %v3173_v14  ;;  %v5956_v48 = vld [vmem:[#allocation17_spill] sm:$0xff] }
 0x146   :  { %v4132_v42 = vadd.f32 %v4131_v6, %v3810_v60  ;;  %v3621_v21 = vmax.f32 %v3557_v29, 0.0  ;;  %vm3237_vm5 = vcmp.lt.f32.partialorder %v2103_v8, 0.5  ;;  %v3812_v12 = vadd.f32 %v3748_v53, %v3428_v20  ;;  %v5955_v6 = vld [vmem:[#allocation16_spill] sm:$0xff] }
 0x147   :  { %v3623_v32 = vmax.f32 %v3559_v40, 0.0  ;;  %v3430_v43 = vmul.f32 0.5, %v3174_v59  ;;  %v3558_v33 = vsub.f32 64.0, %v3174_v59  ;;  %v3560_v49 = vsub.f32 64.0, %v3176_v61 }
 0x148   :  { %v4133_v4 = vadd.f32 %v4132_v42, %v3811_v7  ;;  %v4462_v3 = vsel %vm3237_vm5, 1.0, %v4521_v5  ;;  %v3685_v58 = vsub.f32 %v3621_v21, %v3173_v14  ;;  %vm3239_vm6 = vcmp.lt.f32.partialorder %v2146_v47, 0.5  ;;  %v5957_v42 = vld [vmem:[#allocation18_spill] sm:$0xff] }
 0x149   :  { %v3622_v35 = vmax.f32 %v3558_v33, 0.0  ;;  %v3493_v62 = vmul.f32 0.5, %v4462_v3  ;;  %v3687_v34 = vsub.f32 %v3623_v32, %v3175_v45  ;;  %v3624_v52 = vmax.f32 %v3560_v49, 0.0  ;;  %v2185_v1 = vpop.f32.mrf.mxu0  ;;  %v2228_v9 = vpop.f32.mrf.mxu1 }
 0x14a   :  { %v4134_v50 = vadd.f32 %v4133_v4, %v3812_v12  ;;  %v4464_v15 = vsel %vm3239_vm6, 1.0, %v4521_v5  ;;  %vm3238_vm7 = vcmp.lt.f32.partialorder %v2105_v16, 0.5  ;;  %vm3240_vm8 = vcmp.lt.f32.partialorder %v2148_v44, 0.5 }
 0x14b   :  { %v3749_v13 = vmul.f32 %v3685_v58, %v3493_v62  ;;  %v3495_v54 = vmul.f32 0.5, %v4464_v15  ;;  %v4463_v57 = vsel %vm3238_vm7, 1.0, %v4521_v5  ;;  %v3686_v37 = vsub.f32 %v3622_v35, %v3174_v59  ;;  %v2187_v27 = vpop.f32.mrf.mxu0  ;;  %v2230_v24 = vpop.f32.mrf.mxu1 }
 0x14c   :  { %v3494_v38 = vmul.f32 0.5, %v4463_v57  ;;  %v3688_v25 = vsub.f32 %v3624_v52, %v3176_v61  ;;  %v3113_v36 = vmul.f32 2.0, %v2185_v1  ;;  %v4465_v41 = vsel %vm3240_vm8, 1.0, %v4521_v5 }
 0x14d   :  { %v3813_v2 = vadd.f32 %v3749_v13, %v3429_v31  ;;  %v3751_v46 = vmul.f32 %v3687_v34, %v3495_v54  ;;  %v3115_v11 = vmul.f32 2.0, %v2228_v9  ;;  %v3496_v26 = vmul.f32 0.5, %v4465_v41  ;;  %v2189_v20 = vpop.f32.mrf.mxu0  ;;  %v2232_v21 = vpop.f32.mrf.mxu1 }
 0x14e   :  { %v3750_v39 = vmul.f32 %v3686_v37, %v3494_v38  ;;  %v3177_v30 = vsub.f32 %v5954_v23, %v3113_v36  ;;  %v3114_v14 = vmul.f32 2.0, %v2187_v27  ;;  %v3431_v10 = vmul.f32 0.5, %v3175_v45 }
 0x14f   :  { %v4135_v55 = vadd.f32 %v4134_v50, %v3813_v2  ;;  %v3179_v0 = vsub.f32 %v5955_v6, %v3115_v11  ;;  %v3116_v8 = vmul.f32 2.0, %v2230_v24  ;;  %v3432_v60 = vmul.f32 0.5, %v3176_v61  ;;  %v2191_v3 = vpop.f32.mrf.mxu0  ;;  %v2234_v50 = vpop.f32.mrf.mxu1 }
 0x150   :  { %v3814_v53 = vadd.f32 %v3750_v39, %v3430_v43  ;;  %v3752_v29 = vmul.f32 %v3688_v25, %v3496_v26  ;;  %v3561_v7 = vsub.f32 64.0, %v3177_v30  ;;  %v3815_v40 = vadd.f32 %v3751_v46, %v3431_v10 }
 0x151   :  { %v3563_v59 = vsub.f32 64.0, %v3179_v0  ;;  %v3178_v47 = vsub.f32 %v5956_v48, %v3114_v14  ;;  %v3180_v31 = vsub.f32 %v5957_v42, %v3116_v8  ;;  %v3433_v32 = vmul.f32 0.5, %v3177_v30  ;;  %v5959_v8 = vld [vmem:[#allocation20_spill] sm:$0xff]  ;;  %v5960_v42 = vld [vmem:[#allocation21_spill] sm:$0xff] }
 0x152   :  { %v4136_v12 = vadd.f32 %v4135_v55, %v3814_v53  ;;  %v3625_v33 = vmax.f32 %v3561_v7, 0.0  ;;  %vm3241_vm9 = vcmp.lt.f32.partialorder %v2189_v20, 0.5  ;;  %v3816_v45 = vadd.f32 %v3752_v29, %v3432_v60 }
 0x153   :  { %v3627_v16 = vmax.f32 %v3563_v59, 0.0  ;;  %v3434_v4 = vmul.f32 0.5, %v3178_v47  ;;  %v3562_v49 = vsub.f32 64.0, %v3178_v47  ;;  %v3564_v43 = vsub.f32 64.0, %v3180_v31 }
 0x154   :  { %v4137_v61 = vadd.f32 %v4136_v12, %v3815_v40  ;;  %v4466_v58 = vsel %vm3241_vm9, 1.0, %v4521_v5  ;;  %v3689_v35 = vsub.f32 %v3625_v33, %v3177_v30  ;;  %vm3243_vm10 = vcmp.lt.f32.partialorder %v2232_v21, 0.5  ;;  %v5958_v30 = vld [vmem:[#allocation19_spill] sm:$0xff]  ;;  %v5961_v12 = vld [vmem:[#allocation22_spill] sm:$0xff] }
 0x155   :  { %v3626_v62 = vmax.f32 %v3562_v49, 0.0  ;;  %v3497_v34 = vmul.f32 0.5, %v4466_v58  ;;  %v3691_v44 = vsub.f32 %v3627_v16, %v3179_v0  ;;  %v3628_v15 = vmax.f32 %v3564_v43, 0.0  ;;  %v2271_v38 = vpop.f32.mrf.mxu0  ;;  %v2314_v2 = vpop.f32.mrf.mxu1 }
 0x156   :  { %v4138_v52 = vadd.f32 %v4137_v61, %v3816_v45  ;;  %v4468_v13 = vsel %vm3243_vm10, 1.0, %v4521_v5  ;;  %vm3242_vm11 = vcmp.lt.f32.partialorder %v2191_v3, 0.5  ;;  %vm3244_vm12 = vcmp.lt.f32.partialorder %v2234_v50, 0.5 }
 0x157   :  { %v3753_v54 = vmul.f32 %v3689_v35, %v3497_v34  ;;  %v3499_v57 = vmul.f32 0.5, %v4468_v13  ;;  %v4467_v37 = vsel %vm3242_vm11, 1.0, %v4521_v5  ;;  %v3690_v1 = vsub.f32 %v3626_v62, %v3178_v47  ;;  %v2273_v39 = vpop.f32.mrf.mxu0  ;;  %v2316_v10 = vpop.f32.mrf.mxu1 }
 0x158   :  { %v3498_v25 = vmul.f32 0.5, %v4467_v37  ;;  %v3692_v36 = vsub.f32 %v3628_v15, %v3180_v31  ;;  %v3117_v9 = vmul.f32 2.0, %v2271_v38  ;;  %v4469_v11 = vsel %vm3244_vm12, 1.0, %v4521_v5 }
 0x159   :  { %v3817_v46 = vadd.f32 %v3753_v54, %v3433_v32  ;;  %v3755_v41 = vmul.f32 %v3691_v44, %v3499_v57  ;;  %v3119_v27 = vmul.f32 2.0, %v2314_v2  ;;  %v3500_v23 = vmul.f32 0.5, %v4469_v11  ;;  %v2275_v53 = vpop.f32.mrf.mxu0  ;;  %v2318_v33 = vpop.f32.mrf.mxu1 }
 0x15a   :  { %v3754_v26 = vmul.f32 %v3690_v1, %v3498_v25  ;;  %v3181_v14 = vsub.f32 %v5958_v30, %v3117_v9  ;;  %v3118_v24 = vmul.f32 2.0, %v2273_v39  ;;  %v3435_v55 = vmul.f32 0.5, %v3179_v0 }
 0x15b   :  { %v4139_v6 = vadd.f32 %v4138_v52, %v3817_v46  ;;  %v3183_v20 = vsub.f32 %v5959_v8, %v3119_v27  ;;  %v3120_v60 = vmul.f32 2.0, %v2316_v10  ;;  %v3436_v29 = vmul.f32 0.5, %v3180_v31  ;;  %v2277_v58 = vpop.f32.mrf.mxu0  ;;  %v2320_v52 = vpop.f32.mrf.mxu1 }
 0x15c   :  { %v3818_v7 = vadd.f32 %v3754_v26, %v3434_v4  ;;  %v3756_v40 = vmul.f32 %v3692_v36, %v3500_v23  ;;  %v3565_v59 = vsub.f32 64.0, %v3181_v14  ;;  %v3819_v48 = vadd.f32 %v3755_v41, %v3435_v55 }
 0x15d   :  { %v3567_v47 = vsub.f32 64.0, %v3183_v20  ;;  %v3182_v21 = vsub.f32 %v5960_v42, %v3118_v24  ;;  %v3184_v32 = vsub.f32 %v5961_v12, %v3120_v60  ;;  %v3437_v16 = vmul.f32 0.5, %v3181_v14  ;;  %v5963_v60 = vld [vmem:[#allocation24_spill] sm:$0xff]  ;;  %v5964_v12 = vld [vmem:[#allocation25_spill] sm:$0xff] }
 0x15e   :  { %v4140_v45 = vadd.f32 %v4139_v6, %v3818_v7  ;;  %v3629_v49 = vmax.f32 %v3565_v59, 0.0  ;;  %vm3245_vm13 = vcmp.lt.f32.partialorder %v2275_v53, 0.5  ;;  %v3820_v0 = vadd.f32 %v3756_v40, %v3436_v29 }
 0x15f   :  { %v3631_v3 = vmax.f32 %v3567_v47, 0.0  ;;  %v3438_v61 = vmul.f32 0.5, %v3182_v21  ;;  %v3566_v43 = vsub.f32 64.0, %v3182_v21  ;;  %v3568_v4 = vsub.f32 64.0, %v3184_v32 }
 0x160   :  { %v4141_v31 = vadd.f32 %v4140_v45, %v3819_v48  ;;  %v4470_v35 = vsel %vm3245_vm13, 1.0, %v4521_v5  ;;  %v3693_v62 = vsub.f32 %v3629_v49, %v3181_v14  ;;  %vm3247_vm14 = vcmp.lt.f32.partialorder %v2318_v33, 0.5  ;;  %v5962_v14 = vld [vmem:[#allocation23_spill] sm:$0xff]  ;;  %v5965_v45 = vld [vmem:[#allocation26_spill] sm:$0xff] }
 0x161   :  { %v3630_v34 = vmax.f32 %v3566_v43, 0.0  ;;  %v3501_v44 = vmul.f32 0.5, %v4470_v35  ;;  %v3695_v50 = vsub.f32 %v3631_v3, %v3183_v20  ;;  %v3632_v13 = vmax.f32 %v3568_v4, 0.0  ;;  %v2357_v25 = vpop.f32.mrf.mxu0  ;;  %v2400_v46 = vpop.f32.mrf.mxu1 }
 0x162   :  { %v4142_v15 = vadd.f32 %v4141_v31, %v3820_v0  ;;  %v4472_v54 = vsel %vm3247_vm14, 1.0, %v4521_v5  ;;  %vm3246_vm15 = vcmp.lt.f32.partialorder %v2277_v58, 0.5  ;;  %vm3248_vm0 = vcmp.lt.f32.partialorder %v2320_v52, 0.5 }
 0x163   :  { %v3757_v57 = vmul.f32 %v3693_v62, %v3501_v44  ;;  %v3503_v37 = vmul.f32 0.5, %v4472_v54  ;;  %v4471_v1 = vsel %vm3246_vm15, 1.0, %v4521_v5  ;;  %v3694_v38 = vsub.f32 %v3630_v34, %v3182_v21  ;;  %v2359_v26 = vpop.f32.mrf.mxu0  ;;  %v2402_v55 = vpop.f32.mrf.mxu1 }
 0x164   :  { %v3502_v36 = vmul.f32 0.5, %v4471_v1  ;;  %v3696_v9 = vsub.f32 %v3632_v13, %v3184_v32  ;;  %v3121_v2 = vmul.f32 2.0, %v2357_v25  ;;  %v4473_v27 = vsel %vm3248_vm0, 1.0, %v4521_v5 }
 0x165   :  { %v3821_v41 = vadd.f32 %v3757_v57, %v3437_v16  ;;  %v3759_v11 = vmul.f32 %v3695_v50, %v3503_v37  ;;  %v3123_v39 = vmul.f32 2.0, %v2400_v46  ;;  %v3504_v30 = vmul.f32 0.5, %v4473_v27  ;;  %v2361_v7 = vpop.f32.mrf.mxu0  ;;  %v2404_v49 = vpop.f32.mrf.mxu1 }
 0x166   :  { %v3758_v23 = vmul.f32 %v3694_v38, %v3502_v36  ;;  %v3185_v24 = vsub.f32 %v5962_v14, %v3121_v2  ;;  %v3122_v10 = vmul.f32 2.0, %v2359_v26  ;;  %v3439_v6 = vmul.f32 0.5, %v3183_v20 }
 0x167   :  { %v4143_v8 = vadd.f32 %v4142_v15, %v3821_v41  ;;  %v3187_v53 = vsub.f32 %v5963_v60, %v3123_v39  ;;  %v3124_v29 = vmul.f32 2.0, %v2402_v55  ;;  %v3440_v40 = vmul.f32 0.5, %v3184_v32  ;;  %v2363_v35 = vpop.f32.mrf.mxu0  ;;  %v2406_v15 = vpop.f32.mrf.mxu1 }
 0x168   :  { %v3822_v59 = vadd.f32 %v3758_v23, %v3438_v61  ;;  %v3760_v48 = vmul.f32 %v3696_v9, %v3504_v30  ;;  %v3569_v47 = vsub.f32 64.0, %v3185_v24  ;;  %v3823_v42 = vadd.f32 %v3759_v11, %v3439_v6 }
 0x169   :  { %v3571_v21 = vsub.f32 64.0, %v3187_v53  ;;  %v3186_v33 = vsub.f32 %v5964_v12, %v3122_v10  ;;  %v3188_v16 = vsub.f32 %v5965_v45, %v3124_v29  ;;  %v3441_v3 = vmul.f32 0.5, %v3185_v24  ;;  %v5967_v29 = vld [vmem:[#allocation28_spill] sm:$0xff]  ;;  %v5968_v45 = vld [vmem:[#allocation29_spill] sm:$0xff] }
 0x16a   :  { %v4144_v0 = vadd.f32 %v4143_v8, %v3822_v59  ;;  %v3633_v43 = vmax.f32 %v3569_v47, 0.0  ;;  %vm3249_vm1 = vcmp.lt.f32.partialorder %v2361_v7, 0.5  ;;  %v3824_v20 = vadd.f32 %v3760_v48, %v3440_v40 }
 0x16b   :  { %v3635_v58 = vmax.f32 %v3571_v21, 0.0  ;;  %v3442_v31 = vmul.f32 0.5, %v3186_v33  ;;  %v3570_v4 = vsub.f32 64.0, %v3186_v33  ;;  %v3572_v61 = vsub.f32 64.0, %v3188_v16 }
 0x16c   :  { %v4145_v32 = vadd.f32 %v4144_v0, %v3823_v42  ;;  %v4474_v62 = vsel %vm3249_vm1, 1.0, %v4521_v5  ;;  %v3697_v34 = vsub.f32 %v3633_v43, %v3185_v24  ;;  %vm3251_vm2 = vcmp.lt.f32.partialorder %v2404_v49, 0.5  ;;  %v5966_v24 = vld [vmem:[#allocation27_spill] sm:$0xff]  ;;  %v5969_v0 = vld [vmem:[#allocation30_spill] sm:$0xff] }
 0x16d   :  { %v3634_v44 = vmax.f32 %v3570_v4, 0.0  ;;  %v3505_v50 = vmul.f32 0.5, %v4474_v62  ;;  %v3699_v52 = vsub.f32 %v3635_v58, %v3187_v53  ;;  %v3636_v54 = vmax.f32 %v3572_v61, 0.0  ;;  %v2443_v36 = vpop.f32.mrf.mxu0  ;;  %v2486_v41 = vpop.f32.mrf.mxu1 }
 0x16e   :  { %v4146_v13 = vadd.f32 %v4145_v32, %v3824_v20  ;;  %v4476_v57 = vsel %vm3251_vm2, 1.0, %v4521_v5  ;;  %vm3250_vm3 = vcmp.lt.f32.partialorder %v2363_v35, 0.5  ;;  %vm3252_vm4 = vcmp.lt.f32.partialorder %v2406_v15, 0.5 }
 0x16f   :  { %v3761_v37 = vmul.f32 %v3697_v34, %v3505_v50  ;;  %v3507_v1 = vmul.f32 0.5, %v4476_v57  ;;  %v4475_v38 = vsel %vm3250_vm3, 1.0, %v4521_v5  ;;  %v3698_v25 = vsub.f32 %v3634_v44, %v3186_v33  ;;  %v2445_v23 = vpop.f32.mrf.mxu0  ;;  %v2488_v6 = vpop.f32.mrf.mxu1 }
 0x170   :  { %v3506_v9 = vmul.f32 0.5, %v4475_v38  ;;  %v3700_v2 = vsub.f32 %v3636_v54, %v3188_v16  ;;  %v3125_v46 = vmul.f32 2.0, %v2443_v36  ;;  %v4477_v39 = vsel %vm3252_vm4, 1.0, %v4521_v5 }
 0x171   :  { %v3825_v11 = vadd.f32 %v3761_v37, %v3441_v3  ;;  %v3763_v27 = vmul.f32 %v3699_v52, %v3507_v1  ;;  %v3127_v26 = vmul.f32 2.0, %v2486_v41  ;;  %v3508_v14 = vmul.f32 0.5, %v4477_v39  ;;  %v2447_v59 = vpop.f32.mrf.mxu0  ;;  %v2490_v43 = vpop.f32.mrf.mxu1 }
 0x172   :  { %v3762_v30 = vmul.f32 %v3698_v25, %v3506_v9  ;;  %v3189_v10 = vsub.f32 %v5966_v24, %v3125_v46  ;;  %v3126_v55 = vmul.f32 2.0, %v2445_v23  ;;  %v3443_v8 = vmul.f32 0.5, %v3187_v53 }
 0x173   :  { %v4147_v60 = vadd.f32 %v4146_v13, %v3825_v11  ;;  %v3191_v7 = vsub.f32 %v5967_v29, %v3127_v26  ;;  %v3128_v40 = vmul.f32 2.0, %v2488_v6  ;;  %v3444_v48 = vmul.f32 0.5, %v3188_v16  ;;  %v2449_v62 = vpop.f32.mrf.mxu0  ;;  %v2492_v13 = vpop.f32.mrf.mxu1  ;;  %v5971_v29 = vld [vmem:[#allocation32_spill] sm:$0xff] }
 0x174   :  { %v3826_v47 = vadd.f32 %v3762_v30, %v3442_v31  ;;  %v3764_v42 = vmul.f32 %v3700_v2, %v3508_v14  ;;  %v3573_v21 = vsub.f32 64.0, %v3189_v10  ;;  %v3827_v12 = vadd.f32 %v3763_v27, %v3443_v8 }
 0x175   :  { %v3575_v33 = vsub.f32 64.0, %v3191_v7  ;;  %v3190_v49 = vsub.f32 %v5968_v45, %v3126_v55  ;;  %v3192_v3 = vsub.f32 %v5969_v0, %v3128_v40  ;;  %v3445_v58 = vmul.f32 0.5, %v3189_v10  ;;  %v5972_v0 = vld [vmem:[#allocation33_spill] sm:$0xff] }
 0x176   :  { %v4148_v20 = vadd.f32 %v4147_v60, %v3826_v47  ;;  %v3637_v4 = vmax.f32 %v3573_v21, 0.0  ;;  %vm3253_vm5 = vcmp.lt.f32.partialorder %v2447_v59, 0.5  ;;  %v3828_v53 = vadd.f32 %v3764_v42, %v3444_v48 }
 0x177   :  { %v3639_v35 = vmax.f32 %v3575_v33, 0.0  ;;  %v3446_v32 = vmul.f32 0.5, %v3190_v49  ;;  %v3574_v61 = vsub.f32 64.0, %v3190_v49  ;;  %v3576_v31 = vsub.f32 64.0, %v3192_v3 }
 0x178   :  { %v4149_v16 = vadd.f32 %v4148_v20, %v3827_v12  ;;  %v4478_v34 = vsel %vm3253_vm5, 1.0, %v4521_v5  ;;  %v3701_v44 = vsub.f32 %v3637_v4, %v3189_v10  ;;  %vm3255_vm6 = vcmp.lt.f32.partialorder %v2490_v43, 0.5  ;;  %v5970_v10 = vld [vmem:[#allocation31_spill] sm:$0xff] }
 0x179   :  { %v3638_v50 = vmax.f32 %v3574_v61, 0.0  ;;  %v3509_v52 = vmul.f32 0.5, %v4478_v34  ;;  %v3703_v15 = vsub.f32 %v3639_v35, %v3191_v7  ;;  %v3640_v57 = vmax.f32 %v3576_v31, 0.0  ;;  %v2529_v9 = vpop.f32.mrf.mxu0  ;;  %v2572_v11 = vpop.f32.mrf.mxu1 }
 0x17a   :  { %v4150_v54 = vadd.f32 %v4149_v16, %v3828_v53  ;;  %v4480_v37 = vsel %vm3255_vm6, 1.0, %v4521_v5  ;;  %vm3254_vm7 = vcmp.lt.f32.partialorder %v2449_v62, 0.5  ;;  %vm3256_vm8 = vcmp.lt.f32.partialorder %v2492_v13, 0.5 }
 0x17b   :  { %v3765_v1 = vmul.f32 %v3701_v44, %v3509_v52  ;;  %v3511_v38 = vmul.f32 0.5, %v4480_v37  ;;  %v4479_v25 = vsel %vm3254_vm7, 1.0, %v4521_v5  ;;  %v3702_v36 = vsub.f32 %v3638_v50, %v3190_v49  ;;  %v2531_v30 = vpop.f32.mrf.mxu0  ;;  %v2574_v8 = vpop.f32.mrf.mxu1 }
 0x17c   :  { %v3510_v2 = vmul.f32 0.5, %v4479_v25  ;;  %v3704_v46 = vsub.f32 %v3640_v57, %v3192_v3  ;;  %v3129_v41 = vmul.f32 2.0, %v2529_v9  ;;  %v4481_v26 = vsel %vm3256_vm8, 1.0, %v4521_v5 }
 0x17d   :  { %v3829_v27 = vadd.f32 %v3765_v1, %v3445_v58  ;;  %v3767_v39 = vmul.f32 %v3703_v15, %v3511_v38  ;;  %v3131_v23 = vmul.f32 2.0, %v2572_v11  ;;  %v3512_v24 = vmul.f32 0.5, %v4481_v26  ;;  %v2533_v48 = vpop.f32.mrf.mxu0  ;;  %v2576_v58 = vpop.f32.mrf.mxu1 }
 0x17e   :  { %v3766_v14 = vmul.f32 %v3702_v36, %v3510_v2  ;;  %v3193_v55 = vsub.f32 %v5970_v10, %v3129_v41  ;;  %v3130_v6 = vmul.f32 2.0, %v2531_v30  ;;  %v3132_v59 = vmul.f32 2.0, %v2574_v8 }
 0x17f   :  { %v4151_v60 = vadd.f32 %v4150_v54, %v3829_v27  ;;  %v3195_v40 = vsub.f32 %v5971_v29, %v3131_v23  ;;  %v5883_v47 = vadd.f32 %v2944_v28, %v5409_v22  ;;  %v3447_v42 = vmul.f32 0.5, %v3191_v7  ;;  %v2535_v19 = vpop.f32.mrf.mxu0 }
 0x180   :  { %v3830_v21 = vadd.f32 %v3766_v14, %v3446_v32  ;;  %v3768_v12 = vmul.f32 %v3704_v46, %v3512_v24  ;;  %v3577_v33 = vsub.f32 64.0, %v3193_v55  ;;  %v3448_v45 = vmul.f32 0.5, %v3192_v3 }
 0x181   :  { %v3579_v49 = vsub.f32 64.0, %v3195_v40  ;;  %v3194_v43 = vsub.f32 %v5972_v0, %v3130_v6  ;;  %v3196_v20 = vsub.f32 %v5755_v51, %v3132_v59  ;;  %v3831_v4 = vadd.f32 %v3767_v39, %v3447_v42  ;;  %v2578_v51 = vpop.f32.mrf.mxu1 }
 0x182   :  { %v4152_v53 = vadd.f32 %v4151_v60, %v3830_v21  ;;  %v3641_v35 = vmax.f32 %v3577_v33, 0.0  ;;  %vm3257_vm9 = vcmp.lt.f32.partialorder %v2533_v48, 0.5  ;;  %v3832_v61 = vadd.f32 %v3768_v12, %v3448_v45 }
 0x183   :  { %v3449_v62 = vmul.f32 0.5, %v3193_v55  ;;  %v3643_v17 = vmax.f32 %v3579_v49, 0.0  ;;  %v3578_v22 = vsub.f32 64.0, %v3194_v43  ;;  %v3580_v7 = vsub.f32 64.0, %v3196_v20 }
 0x184   :  { %v4153_v28 = vadd.f32 %v4152_v53, %v3831_v4  ;;  %v4482_v32 = vsel %vm3257_vm9, 1.0, %v4521_v5  ;;  %v3705_v3 = vsub.f32 %v3641_v35, %v3193_v55  ;;  %vm3259_vm10 = vcmp.lt.f32.partialorder %v2576_v58, 0.5 }
 0x185   :  { %v3642_v16 = vmax.f32 %v3578_v22, 0.0  ;;  %v3513_v31 = vmul.f32 0.5, %v4482_v32  ;;  %v3707_v34 = vsub.f32 %v3643_v17, %v3195_v40  ;;  %v3450_v44 = vmul.f32 0.5, %v3194_v43  ;;  %v2615_v37 = vpop.f32.mrf.mxu0  ;;  %v2658_v36 = vpop.f32.mrf.mxu1 }
 0x186   :  { %v3644_v50 = vmax.f32 %v3580_v7, 0.0  ;;  %v4484_v52 = vsel %vm3259_vm10, 1.0, %v4521_v5  ;;  %vm3258_vm11 = vcmp.lt.f32.partialorder %v2535_v19, 0.5  ;;  %v4154_v1 = vadd.f32 %v4153_v28, %v3832_v61 }
 0x187   :  { %v3769_v15 = vmul.f32 %v3705_v3, %v3513_v31  ;;  %v3515_v13 = vmul.f32 0.5, %v4484_v52  ;;  %v4483_v54 = vsel %vm3258_vm11, 1.0, %v4521_v5  ;;  %v3706_v57 = vsub.f32 %v3642_v16, %v3194_v43  ;;  %v2617_v11 = vpop.f32.mrf.mxu0  ;;  %v2660_v30 = vpop.f32.mrf.mxu1 }
 0x188   :  { %v3514_v38 = vmul.f32 0.5, %v4483_v54  ;;  %vm3260_vm12 = vcmp.lt.f32.partialorder %v2578_v51, 0.5  ;;  %v3133_v25 = vmul.f32 2.0, %v2615_v37  ;;  %v3135_v41 = vmul.f32 2.0, %v2658_v36 }
 0x189   :  { %v3833_v9 = vadd.f32 %v3769_v15, %v3449_v62  ;;  %v3771_v2 = vmul.f32 %v3707_v34, %v3515_v13  ;;  %v4485_v46 = vsel %vm3260_vm12, 1.0, %v4521_v5  ;;  %v3708_v39 = vsub.f32 %v3644_v50, %v3196_v20  ;;  %v2619_v6 = vpop.f32.mrf.mxu0  ;;  %v2662_v48 = vpop.f32.mrf.mxu1 }
 0x18a   :  { %v3770_v27 = vmul.f32 %v3706_v57, %v3514_v38  ;;  %v3197_v26 = vsub.f32 %v5758_v18, %v3133_v25  ;;  %v3134_v23 = vmul.f32 2.0, %v2617_v11  ;;  %v3451_v14 = vmul.f32 0.5, %v3195_v40 }
 0x18b   :  { %v4155_v24 = vadd.f32 %v4154_v1, %v3833_v9  ;;  %v3199_v10 = vsub.f32 %v5763_v56, %v3135_v41  ;;  %v3136_v55 = vmul.f32 2.0, %v2660_v30  ;;  %v3452_v8 = vmul.f32 0.5, %v3196_v20  ;;  %v2621_v40 = vpop.f32.mrf.mxu0  ;;  %v2664_v35 = vpop.f32.mrf.mxu1 }
 0x18c   :  { %v3834_v60 = vadd.f32 %v3770_v27, %v3450_v44  ;;  %v3516_v29 = vmul.f32 0.5, %v4485_v46  ;;  %v3581_v59 = vsub.f32 64.0, %v3197_v26  ;;  %v3835_v42 = vadd.f32 %v3771_v2, %v3451_v14 }
 0x18d   :  { %v3583_v21 = vsub.f32 64.0, %v3199_v10  ;;  %v3198_v12 = vsub.f32 %v5805_v63, %v3134_v23  ;;  %v3200_v33 = vsub.f32 %v5883_v47, %v3136_v55  ;;  %vm3261_vm13 = vcmp.lt.f32.partialorder %v2619_v6, 0.5 }
 0x18e   :  { %v4156_v18 = vadd.f32 %v4155_v24, %v3834_v60  ;;  %v3772_v45 = vmul.f32 %v3708_v39, %v3516_v29  ;;  %v3645_v49 = vmax.f32 %v3581_v59, 0.0  ;;  %v4486_v20 = vsel %vm3261_vm13, 1.0, %v4521_v5 }
 0x18f   :  { %v3647_v0 = vmax.f32 %v3583_v21, 0.0  ;;  %v3582_v56 = vsub.f32 64.0, %v3198_v12  ;;  %v3584_v43 = vsub.f32 64.0, %v3200_v33  ;;  %v3517_v4 = vmul.f32 0.5, %v4486_v20 }
 0x190   :  { %v4157_v58 = vadd.f32 %v4156_v18, %v3835_v42  ;;  %v3709_v53 = vsub.f32 %v3645_v49, %v3197_v26  ;;  %vm3263_vm14 = vcmp.lt.f32.partialorder %v2662_v48, 0.5  ;;  %v3453_v61 = vmul.f32 0.5, %v3197_v26 }
 0x191   :  { %vm3262_vm15 = vcmp.lt.f32.partialorder %v2621_v40, 0.5  ;;  %v3836_v63 = vadd.f32 %v3772_v45, %v3452_v8  ;;  %v4488_v47 = vsel %vm3263_vm14, 1.0, %v4521_v5  ;;  %v3711_v22 = vsub.f32 %v3647_v0, %v3199_v10 }
 0x192   :  { %v3773_v62 = vmul.f32 %v3709_v53, %v3517_v4  ;;  %v4487_v17 = vsel %vm3262_vm15, 1.0, %v4521_v5  ;;  %v3646_v19 = vmax.f32 %v3582_v56, 0.0  ;;  %vm3264_vm0 = vcmp.lt.f32.partialorder %v2664_v35, 0.5 }
 0x193   :  { %v3648_v28 = vmax.f32 %v3584_v43, 0.0  ;;  %v4158_v7 = vadd.f32 %v4157_v58, %v3836_v63  ;;  %v4489_v3 = vsel %vm3264_vm0, 1.0, %v4521_v5  ;;  %v3519_v16 = vmul.f32 0.5, %v4488_v47 }
 0x194   :  { %v3837_v32 = vadd.f32 %v3773_v62, %v3453_v61  ;;  %v3518_v31 = vmul.f32 0.5, %v4487_v17  ;;  %v3710_v34 = vsub.f32 %v3646_v19, %v3198_v12  ;;  %v3454_v44 = vmul.f32 0.5, %v3198_v12 }
 0x195   :  { %v3712_v51 = vsub.f32 %v3648_v28, %v3200_v33  ;;  %v3775_v50 = vmul.f32 %v3711_v22, %v3519_v16  ;;  %v3520_v15 = vmul.f32 0.5, %v4489_v3  ;;  %v3455_v54 = vmul.f32 0.5, %v3199_v10 }
 0x196   :  { %v3774_v52 = vmul.f32 %v3710_v34, %v3518_v31  ;;  %v4159_v13 = vadd.f32 %v4158_v7, %v3837_v32  ;;  %v3456_v1 = vmul.f32 0.5, %v3200_v33  ;;  %vm4176_vm1 = vcmask 0  }
 0x197   :  { %v3776_v37 = vmul.f32 %v3712_v51, %v3520_v15  ;;  %v3839_v38 = vadd.f32 %v3775_v50, %v3455_v54 }
 0x198   :  { %v3838_v57 = vadd.f32 %v3774_v52, %v3454_v44 }
 0x199   :  { %v3840_v36 = vadd.f32 %v3776_v37, %v3456_v1 }
 0x19a   :  { %v4160_v25 = vadd.f32 %v4159_v13, %v3838_v57 }
 0x19c   :  { %v4161_v9 = vadd.f32 %v4160_v25, %v3839_v38 }
 0x19e   :  { %v4162_v2 = vadd.f32 %v4161_v9, %v3840_v36 }
 0x1a0   :  { %4163 = vadd.xlane.f32.xlu0 %v4162_v2 }
 0x229   :  { %v4164_v5 = vpop.xlane.xlu0 %4163 }
 0x22a   :  { %v4165_v46 = vrot.slane %v4164_v5, 4 }
 0x22c   :  { %v4166_v41 = vadd.f32 %v4165_v46, %v4164_v5 }
 0x22e   :  { %v4167_v11 = vrot.slane %v4166_v41, 2 }
 0x230   :  { %v4168_v27 = vadd.f32 %v4167_v11, %v4166_v41 }
 0x232   :  { %v4169_v39 = vrot.slane %v4168_v27, 1 }
 0x234   :  { %v4170_v26 = vadd.f32 %v4169_v39, %v4168_v27 }
 0x236   :  { %4490 = vpush %v4170_v26 }
 0x267   :  { %s4491_s17 = spop %4490 }
 0x268   :  { %s4174_s18 = smul.f32 6.25e-05, %s4491_s17 }
 0x26a   :  { %v4175_v23 = vstv %s4174_s18 }
 0x26b   :  { %4177 = vst.msk [vmem:[#allocation3] sm:$0x1] %vm4176_vm1, %v4175_v23 }
 0x26c   :  { %4509 = shalt.err (!%p4506_p4)
}
 0x26d   :  { %4187 = dma.vmem_to_hbm [thread:$0]  %s4185_s16, 16, %s5906_s4, [#allocation4]  }
 0x26e   :  { %4518 = dma.done.wait [#allocation4], 16  }
 0x26f   :  { %4519 = vsyncadd [#allocation4], 4294967280 }
 0x270   :  { %4191 = vsyncpa [#allocation4], 1 }

</bundles_post_ra>
